<compile_context>
chip_gen: v6e
topology: v6e:2x2x1
jax: 0.10.0
libtpu: 0.0.40
codegen_flags: <defaults>
</compile_context>

<pallas_src>
import functools
import math

import jax
import jax.numpy as jnp
import numpy as np
from jax.experimental import pallas as pl
from jax.experimental.pallas import tpu as pltpu

SQRT2 = math.sqrt(2.0)


# ---------------------------------------------------------------------------
# Kernel parameter layout (all Linear weights pre-transposed to (in, out)):
#   w1   : (D, 3D) bf16   attn1 fused projection, columns [key | query | value]
#   b1   : (1, 3D) f32    attn1 fused bias
#   w2kv : (D, 2D) bf16   attn2 key/value projection, columns [key | value]
#   b2kv : (1, 2D) f32
#   w2q  : (D, D)  bf16   attn2 query projection
#   b2q  : (1, D)  f32
#   wm   : (4, D, D) bf16 0 = attn1.proj, 1 = attn2.proj, 2 = mlp.fc1, 3 = mlp.fc2
#   vv   : (10, D) f32    0..3 biases {proj1, proj2, fc1, fc2};
#                         4,5 ln1 {gamma, beta}; 6,7 ln2; 8,9 ln3
# ---------------------------------------------------------------------------
def _decode_block_kernel(x_ref, rep_ref, w1_ref, b1_ref, w2kv_ref, b2kv_ref,
                         w2q_ref, b2q_ref, wm_ref, vv_ref, o_ref, *,
                         n_head, batch):
    BL, D = x_ref.shape
    B = batch
    L = BL // B
    hd = D // n_head
    f32 = jnp.float32
    bf16 = jnp.bfloat16

    x = x_ref[...].astype(f32)      # (B*L, D)
    rep = rep_ref[...].astype(f32)  # (B*L, D)

    def vec(i):                     # (1, D) f32, broadcasts over rows
        return vv_ref[i:i + 1, :]

    def layer_norm(h, gi, bi):      # PyTorch LayerNorm: biased var, eps=1e-5
        mu = jnp.mean(h, axis=-1, keepdims=True)
        var = jnp.mean((h - mu) ** 2, axis=-1, keepdims=True)
        return (h - mu) * jax.lax.rsqrt(var + 1e-5) * vec(gi) + vec(bi)

    def gelu(h):
        # tanh-approx GELU: one EUP tanh, error vs exact-erf GELU ~1e-3 absolute.
        c = 0.7978845608028654      # sqrt(2/pi)
        return 0.5 * h * (1.0 + jnp.tanh(c * (h + 0.044715 * h * h * h)))

    # Causal (tril) mask shared by both attentions, broadcast over batch.
    row = jax.lax.broadcasted_iota(jnp.int32, (L, L), 0)   # query index i
    col = jax.lax.broadcasted_iota(jnp.int32, (L, L), 1)   # key index j
    causal = (row >= col)[None, :, :]                      # (1, L, L)
    scale = 1.0 / math.sqrt(hd)
    NEG = -1e9                                             # finite fill: NaN-safe

    def mha(k, q, v, proj_i):
        # k, q, v: (BL, D) f32.  Per-head batched (over B) dots; head outputs stay
        # in values and are assembled with one lane concat (no VMEM scratch bounce).
        ys = []
        for h in range(n_head):
            sl = slice(h * hd, (h + 1) * hd)
            qh = q[:, sl].reshape(B, L, hd).astype(bf16)
            kh = k[:, sl].reshape(B, L, hd).astype(bf16)
            vh = v[:, sl].reshape(B, L, hd).astype(bf16)
            # att[b, i, j] = <q_i, k_j> / sqrt(hd)
            att = jax.lax.dot_general(
                qh, kh, (((2,), (2,)), ((0,), (0,))),
                preferred_element_type=f32) * scale        # (B, Lq, Lk) f32
            att = jnp.where(causal, att, NEG)
            # Reference applies F.softmax(att, dim=2) == softmax over the QUERY axis.
            att = att - jnp.max(att, axis=1, keepdims=True)
            e = jnp.exp(att)
            inv = pl.reciprocal(jnp.sum(e, axis=1, keepdims=True), approx=True)
            att = (e * inv).astype(bf16)
            yh = jax.lax.dot_general(
                att, vh, (((2,), (1,)), ((0,), (0,))),
                preferred_element_type=f32)                 # (B, Lq, hd) f32
            ys.append(yh.reshape(BL, hd))
        y = jnp.concatenate(ys, axis=-1)                    # (BL, D) f32
        return jnp.dot(y.astype(bf16), wm_ref[proj_i],
                       preferred_element_type=f32) + vec(proj_i)

    def attn1(h_in):
        # key == value == query source: one fused (BL, D) @ (D, 3D) matmul.
        kqv = jnp.dot(h_in.astype(bf16), w1_ref[...],
                      preferred_element_type=f32) + b1_ref[...]
        return mha(kqv[:, 0:D], kqv[:, D:2 * D], kqv[:, 2 * D:3 * D], 0)

    def attn2(kv_in, q_in):
        # Two right-sized matmuls (no row concat, no wasted columns).
        kv = jnp.dot(kv_in.astype(bf16), w2kv_ref[...],
                     preferred_element_type=f32) + b2kv_ref[...]    # (BL, 2D) [k|v]
        q = jnp.dot(q_in.astype(bf16), w2q_ref[...],
                    preferred_element_type=f32) + b2q_ref[...]      # (BL, D)
        return mha(kv[:, 0:D], q, kv[:, D:2 * D], 1)

    def mlp(h):
        h1 = jnp.dot(h.astype(bf16), wm_ref[2], preferred_element_type=f32) + vec(2)
        h1 = gelu(h1)
        return jnp.dot(h1.astype(bf16), wm_ref[3], preferred_element_type=f32) + vec(3)

    h = layer_norm(x + attn1(x), 4, 5)            # ln1
    h = layer_norm(rep + attn2(h, rep), 6, 7)     # ln2
    h = layer_norm(h + mlp(h), 8, 9)              # ln3
    o_ref[...] = h.astype(o_ref.dtype)


def decode_block_forward(x, rep_enc, Wqkv, Bqkv, Wm, Vv, n_head):
    """x, rep_enc: (B, L, D).  Wqkv: (2, D, 3D) cols [k|q|v]; Bqkv: (2, 3D);
    Wm: (4, D, D); Vv: (10, D).  Row 0 of Wqkv/Bqkv = attn1, row 1 = attn2."""
    B, L, D = x.shape
    BL = B * L
    f32, bf16 = jnp.float32, jnp.bfloat16

    # Fold batch into rows; one gridless pallas_call covers the whole block.
    x2 = x.reshape(BL, D)
    rep2 = rep_enc.reshape(BL, D)

    # attn1: keep fused [k|q|v] pack (same source activation feeds all three).
    w1 = Wqkv[0].astype(bf16)                                    # (D, 3D)
    b1 = Bqkv[0:1, :].astype(f32)                                # (1, 3D)
    # attn2: repack as separate [k|v] (from h) and [q] (from rep) projections.
    w2kv = jnp.concatenate([Wqkv[1, :, 0:D], Wqkv[1, :, 2 * D:3 * D]],
                           axis=1).astype(bf16)                  # (D, 2D)
    b2kv = jnp.concatenate([Bqkv[1:2, 0:D], Bqkv[1:2, 2 * D:3 * D]],
                           axis=1).astype(f32)                   # (1, 2D)
    w2q = Wqkv[1, :, D:2 * D].astype(bf16)                       # (D, D)
    b2q = Bqkv[1:2, D:2 * D].astype(f32)                         # (1, D)
    wm = Wm.astype(bf16)                                         # (4, D, D)
    vv = Vv.astype(f32)                                          # (10, D)

    kernel = functools.partial(_decode_block_kernel, n_head=n_head, batch=B)
    out = pl.pallas_call(
        kernel,
        out_shape=jax.ShapeDtypeStruct((BL, D), x.dtype),
        compiler_params=pltpu.CompilerParams(
            vmem_limit_bytes=32 * 1024 * 1024),
    )(x2, rep2, w1, b1, w2kv, b2kv, w2q, b2q, wm, vv)
    return out.reshape(B, L, D)


# ---------------------------------------------------------------------------
# Pure-JAX reference (direct transcription of the PyTorch forward), using the
# original packed parameters in f32 throughout.
# ---------------------------------------------------------------------------
def decode_block_ref(x, rep, Wqkv, Bqkv, Wm, Vv, n_head):
    D = x.shape[-1]

    def ln(h, gi, bi):
        mu = h.mean(-1, keepdims=True)
        var = ((h - mu) ** 2).mean(-1, keepdims=True)
        return (h - mu) / jnp.sqrt(var + 1e-5) * Vv[gi] + Vv[bi]

    def attn(key, value, query, ai):
        B, L, _ = query.shape
        hd = D // n_head
        k = key @ Wqkv[ai, :, 0 * D:1 * D] + Bqkv[ai, 0 * D:1 * D]
        q = query @ Wqkv[ai, :, 1 * D:2 * D] + Bqkv[ai, 1 * D:2 * D]
        v = value @ Wqkv[ai, :, 2 * D:3 * D] + Bqkv[ai, 2 * D:3 * D]
        k = k.reshape(B, L, n_head, hd).transpose(0, 2, 1, 3)
        q = q.reshape(B, L, n_head, hd).transpose(0, 2, 1, 3)
        v = v.reshape(B, L, n_head, hd).transpose(0, 2, 1, 3)
        att = (q @ jnp.swapaxes(k, -1, -2)) * (1.0 / math.sqrt(hd))
        mask = jnp.tril(jnp.ones((L, L)))[None, None]
        att = jnp.where(mask == 0, -jnp.inf, att)
        att = jax.nn.softmax(att, axis=2)                 # softmax over query axis
        y = (att @ v).transpose(0, 2, 1, 3).reshape(B, L, D)
        return y @ Wm[ai] + Vv[ai]

    def mlp(h):
        h1 = h @ Wm[2] + Vv[2]
        h1 = 0.5 * h1 * (1.0 + jax.lax.erf(h1 / SQRT2))   # exact-erf GELU
        return h1 @ Wm[3] + Vv[3]

    h = ln(x + attn(x, x, x, 0), 4, 5)
    h = ln(rep + attn(h, h, rep, 1), 6, 7)
    h = ln(h + mlp(h), 8, 9)
    return h


if __name__ == "__main__":
    B, n_embd, n_head, n_agent = 2, 32, 4, 7
    L = n_agent + 1                  # attention mask buffer is (n_agent+1)^2
    D = n_embd

    key = jax.random.PRNGKey(0)
    k1, k2, k3, k4, kx, kr = jax.random.split(key, 6)

    # Deterministic synthetic parameters (shapes from DecodeBlock.__init__),
    # packed as described above.
    Wqkv = jax.random.normal(k1, (2, D, 3 * D), jnp.float32) * 0.1
    Bqkv = jax.random.normal(k2, (2, 3 * D), jnp.float32) * 0.05
    Wm = jax.random.normal(k3, (4, D, D), jnp.float32) * 0.1
    Vv = jax.random.normal(k4, (10, D), jnp.float32) * 0.05
    # LayerNorm gammas centered around 1 (indices 4, 6, 8).
    Vv = Vv.at[4].add(1.0).at[6].add(1.0).at[8].add(1.0)

    x = jax.random.normal(kx, (B, L, D), jnp.float32)
    rep_enc = jax.random.normal(kr, (B, L, D), jnp.float32)

    out = decode_block_forward(x, rep_enc, Wqkv, Bqkv, Wm, Vv, n_head)
    jax.block_until_ready(out)

    ref = decode_block_ref(x, rep_enc, Wqkv, Bqkv, Wm, Vv, n_head)
    # Tolerance covers bf16 MXU operands (~0.4% rel per matmul, 3 residual/LN stages),
    # pl.reciprocal(approx=True) in the softmax, and the tanh-approx GELU.
    np.testing.assert_allclose(np.asarray(out), np.asarray(ref),
                               atol=3e-2, rtol=3e-2)
    print("KERNEL_OK")
</pallas_src>

<mosaic_0001>
module attributes {stable_mosaic.version = 11 : i64} {
  func.func @_decode_block_kernel(%arg0: memref<16x32xf32, #tpu.memory_space<vmem>>, %arg1: memref<16x32xf32, #tpu.memory_space<vmem>>, %arg2: memref<32x96xbf16, #tpu.memory_space<vmem>>, %arg3: memref<1x96xf32, #tpu.memory_space<vmem>>, %arg4: memref<32x64xbf16, #tpu.memory_space<vmem>>, %arg5: memref<1x64xf32, #tpu.memory_space<vmem>>, %arg6: memref<32x32xbf16, #tpu.memory_space<vmem>>, %arg7: memref<1x32xf32, #tpu.memory_space<vmem>>, %arg8: memref<4x32x32xbf16, #tpu.memory_space<vmem>>, %arg9: memref<10x32xf32, #tpu.memory_space<vmem>>, %arg10: memref<16x32xf32, #tpu.memory_space<vmem>>) attributes {dimension_semantics = [], scalar_prefetch = 0 : i64, scratch_operands = 0 : i64, tpu.core_type = #tpu.core_type<tc>} {
    %c0 = arith.constant 0 : index
    %c0_0 = arith.constant 0 : index
    %0 = vector.load %arg0[%c0, %c0_0] : memref<16x32xf32, #tpu.memory_space<vmem>>, vector<16x32xf32>
    %c0_1 = arith.constant 0 : index
    %c0_2 = arith.constant 0 : index
    %1 = vector.load %arg1[%c0_1, %c0_2] : memref<16x32xf32, #tpu.memory_space<vmem>>, vector<16x32xf32>
    %2 = tpu.iota {dimensions = array<i32: 0>} : vector<8x8xi32>
    %3 = tpu.iota {dimensions = array<i32: 1>} : vector<8x8xi32>
    %4 = arith.cmpi sge, %2, %3 : vector<8x8xi32>
    %5 = vector.shape_cast %4 : vector<8x8xi1> to vector<1x8x8xi1>
    %6 = arith.truncf %0 : vector<16x32xf32> to vector<16x32xbf16>
    %c0_3 = arith.constant 0 : index
    %c0_4 = arith.constant 0 : index
    %7 = vector.load %arg2[%c0_3, %c0_4] : memref<32x96xbf16, #tpu.memory_space<vmem>>, vector<32x96xbf16>
    %cst = arith.constant dense<0.000000e+00> : vector<16x96xf32>
    %8 = tpu.matmul %6, %7, %cst {dimension_numbers = #tpu.dot_dimension_numbers<[1], [0], [0], [1], [0, 0, 1, 1], [], []>} : vector<16x32xbf16>, vector<32x96xbf16>, vector<16x96xf32> -> vector<16x96xf32>
    %c0_5 = arith.constant 0 : index
    %c0_6 = arith.constant 0 : index
    %9 = vector.load %arg3[%c0_5, %c0_6] : memref<1x96xf32, #tpu.memory_space<vmem>>, vector<1x96xf32>
    %10 = vector.broadcast %9 : vector<1x96xf32> to vector<16x96xf32>
    %11 = arith.addf %8, %10 : vector<16x96xf32>
    %12 = vector.extract_strided_slice %11 {offsets = [0, 0], sizes = [16, 32], strides = [1, 1]} : vector<16x96xf32> to vector<16x32xf32>
    %13 = vector.extract_strided_slice %11 {offsets = [0, 32], sizes = [16, 32], strides = [1, 1]} : vector<16x96xf32> to vector<16x32xf32>
    %14 = vector.extract_strided_slice %11 {offsets = [0, 64], sizes = [16, 32], strides = [1, 1]} : vector<16x96xf32> to vector<16x32xf32>
    %15 = vector.extract_strided_slice %13 {offsets = [0, 0], sizes = [16, 8], strides = [1, 1]} : vector<16x32xf32> to vector<16x8xf32>
    %16 = vector.shape_cast %15 : vector<16x8xf32> to vector<2x8x8xf32>
    %17 = arith.truncf %16 : vector<2x8x8xf32> to vector<2x8x8xbf16>
    %18 = vector.extract_strided_slice %12 {offsets = [0, 0], sizes = [16, 8], strides = [1, 1]} : vector<16x32xf32> to vector<16x8xf32>
    %19 = vector.shape_cast %18 : vector<16x8xf32> to vector<2x8x8xf32>
    %20 = arith.truncf %19 : vector<2x8x8xf32> to vector<2x8x8xbf16>
    %21 = vector.extract_strided_slice %14 {offsets = [0, 0], sizes = [16, 8], strides = [1, 1]} : vector<16x32xf32> to vector<16x8xf32>
    %22 = vector.shape_cast %21 : vector<16x8xf32> to vector<2x8x8xf32>
    %23 = arith.truncf %22 : vector<2x8x8xf32> to vector<2x8x8xbf16>
    %cst_7 = arith.constant dense<0.000000e+00> : vector<2x8x8xf32>
    %24 = tpu.matmul %17, %20, %cst_7 {dimension_numbers = #tpu.dot_dimension_numbers<[2], [2], [1], [1], [0, 0, 0, 1, 1, 1], [0], [0]>} : vector<2x8x8xbf16>, vector<2x8x8xbf16>, vector<2x8x8xf32> -> vector<2x8x8xf32>
    %cst_8 = arith.constant 0.353553385 : f32
    %25 = vector.broadcast %cst_8 : f32 to vector<2x8x8xf32>
    %26 = arith.mulf %24, %25 : vector<2x8x8xf32>
    %cst_9 = arith.constant -1.000000e+09 : f32
    %27 = vector.shape_cast %5 : vector<1x8x8xi1> to vector<1x8x8xi1>
    %28 = vector.broadcast %27 : vector<1x8x8xi1> to vector<2x8x8xi1>
    %29 = vector.broadcast %cst_9 : f32 to vector<2x8x8xf32>
    %30 = arith.select %28, %26, %29 : vector<2x8x8xi1>, vector<2x8x8xf32>
    %cst_10 = arith.constant dense<0xFF800000> : vector<2x8xf32>
    %31 = vector.multi_reduction <maximumf>, %30, %cst_10 [1] : vector<2x8x8xf32> to vector<2x8xf32>
    %32 = vector.shape_cast %31 : vector<2x8xf32> to vector<2x1x8xf32>
    %33 = vector.broadcast %32 : vector<2x1x8xf32> to vector<2x8x8xf32>
    %34 = arith.subf %30, %33 : vector<2x8x8xf32>
    %35 = math.exp %34 : vector<2x8x8xf32>
    %cst_11 = arith.constant dense<0.000000e+00> : vector<2x8xf32>
    %36 = vector.multi_reduction <add>, %35, %cst_11 [1] : vector<2x8x8xf32> to vector<2x8xf32>
    %37 = vector.shape_cast %36 : vector<2x8xf32> to vector<2x1x8xf32>
    %38 = tpu.reciprocal %37 {approx = true} : vector<2x1x8xf32> -> vector<2x1x8xf32>
    %39 = vector.broadcast %38 : vector<2x1x8xf32> to vector<2x8x8xf32>
    %40 = arith.mulf %35, %39 : vector<2x8x8xf32>
    %41 = arith.truncf %40 : vector<2x8x8xf32> to vector<2x8x8xbf16>
    %cst_12 = arith.constant dense<0.000000e+00> : vector<2x8x8xf32>
    %42 = tpu.matmul %41, %23, %cst_12 {dimension_numbers = #tpu.dot_dimension_numbers<[2], [1], [1], [2], [0, 0, 0, 1, 1, 2], [0], [0]>} : vector<2x8x8xbf16>, vector<2x8x8xbf16>, vector<2x8x8xf32> -> vector<2x8x8xf32>
    %43 = vector.shape_cast %42 : vector<2x8x8xf32> to vector<16x8xf32>
    %44 = vector.extract_strided_slice %13 {offsets = [0, 8], sizes = [16, 8], strides = [1, 1]} : vector<16x32xf32> to vector<16x8xf32>
    %45 = vector.shape_cast %44 : vector<16x8xf32> to vector<2x8x8xf32>
    %46 = arith.truncf %45 : vector<2x8x8xf32> to vector<2x8x8xbf16>
    %47 = vector.extract_strided_slice %12 {offsets = [0, 8], sizes = [16, 8], strides = [1, 1]} : vector<16x32xf32> to vector<16x8xf32>
    %48 = vector.shape_cast %47 : vector<16x8xf32> to vector<2x8x8xf32>
    %49 = arith.truncf %48 : vector<2x8x8xf32> to vector<2x8x8xbf16>
    %50 = vector.extract_strided_slice %14 {offsets = [0, 8], sizes = [16, 8], strides = [1, 1]} : vector<16x32xf32> to vector<16x8xf32>
    %51 = vector.shape_cast %50 : vector<16x8xf32> to vector<2x8x8xf32>
    %52 = arith.truncf %51 : vector<2x8x8xf32> to vector<2x8x8xbf16>
    %cst_13 = arith.constant dense<0.000000e+00> : vector<2x8x8xf32>
    %53 = tpu.matmul %46, %49, %cst_13 {dimension_numbers = #tpu.dot_dimension_numbers<[2], [2], [1], [1], [0, 0, 0, 1, 1, 1], [0], [0]>} : vector<2x8x8xbf16>, vector<2x8x8xbf16>, vector<2x8x8xf32> -> vector<2x8x8xf32>
    %cst_14 = arith.constant 0.353553385 : f32
    %54 = vector.broadcast %cst_14 : f32 to vector<2x8x8xf32>
    %55 = arith.mulf %53, %54 : vector<2x8x8xf32>
    %cst_15 = arith.constant -1.000000e+09 : f32
    %56 = vector.shape_cast %5 : vector<1x8x8xi1> to vector<1x8x8xi1>
    %57 = vector.broadcast %56 : vector<1x8x8xi1> to vector<2x8x8xi1>
    %58 = vector.broadcast %cst_15 : f32 to vector<2x8x8xf32>
    %59 = arith.select %57, %55, %58 : vector<2x8x8xi1>, vector<2x8x8xf32>
    %cst_16 = arith.constant dense<0xFF800000> : vector<2x8xf32>
    %60 = vector.multi_reduction <maximumf>, %59, %cst_16 [1] : vector<2x8x8xf32> to vector<2x8xf32>
    %61 = vector.shape_cast %60 : vector<2x8xf32> to vector<2x1x8xf32>
    %62 = vector.broadcast %61 : vector<2x1x8xf32> to vector<2x8x8xf32>
    %63 = arith.subf %59, %62 : vector<2x8x8xf32>
    %64 = math.exp %63 : vector<2x8x8xf32>
    %cst_17 = arith.constant dense<0.000000e+00> : vector<2x8xf32>
    %65 = vector.multi_reduction <add>, %64, %cst_17 [1] : vector<2x8x8xf32> to vector<2x8xf32>
    %66 = vector.shape_cast %65 : vector<2x8xf32> to vector<2x1x8xf32>
    %67 = tpu.reciprocal %66 {approx = true} : vector<2x1x8xf32> -> vector<2x1x8xf32>
    %68 = vector.broadcast %67 : vector<2x1x8xf32> to vector<2x8x8xf32>
    %69 = arith.mulf %64, %68 : vector<2x8x8xf32>
    %70 = arith.truncf %69 : vector<2x8x8xf32> to vector<2x8x8xbf16>
    %cst_18 = arith.constant dense<0.000000e+00> : vector<2x8x8xf32>
    %71 = tpu.matmul %70, %52, %cst_18 {dimension_numbers = #tpu.dot_dimension_numbers<[2], [1], [1], [2], [0, 0, 0, 1, 1, 2], [0], [0]>} : vector<2x8x8xbf16>, vector<2x8x8xbf16>, vector<2x8x8xf32> -> vector<2x8x8xf32>
    %72 = vector.shape_cast %71 : vector<2x8x8xf32> to vector<16x8xf32>
    %73 = vector.extract_strided_slice %13 {offsets = [0, 16], sizes = [16, 8], strides = [1, 1]} : vector<16x32xf32> to vector<16x8xf32>
    %74 = vector.shape_cast %73 : vector<16x8xf32> to vector<2x8x8xf32>
    %75 = arith.truncf %74 : vector<2x8x8xf32> to vector<2x8x8xbf16>
    %76 = vector.extract_strided_slice %12 {offsets = [0, 16], sizes = [16, 8], strides = [1, 1]} : vector<16x32xf32> to vector<16x8xf32>
    %77 = vector.shape_cast %76 : vector<16x8xf32> to vector<2x8x8xf32>
    %78 = arith.truncf %77 : vector<2x8x8xf32> to vector<2x8x8xbf16>
    %79 = vector.extract_strided_slice %14 {offsets = [0, 16], sizes = [16, 8], strides = [1, 1]} : vector<16x32xf32> to vector<16x8xf32>
    %80 = vector.shape_cast %79 : vector<16x8xf32> to vector<2x8x8xf32>
    %81 = arith.truncf %80 : vector<2x8x8xf32> to vector<2x8x8xbf16>
    %cst_19 = arith.constant dense<0.000000e+00> : vector<2x8x8xf32>
    %82 = tpu.matmul %75, %78, %cst_19 {dimension_numbers = #tpu.dot_dimension_numbers<[2], [2], [1], [1], [0, 0, 0, 1, 1, 1], [0], [0]>} : vector<2x8x8xbf16>, vector<2x8x8xbf16>, vector<2x8x8xf32> -> vector<2x8x8xf32>
    %cst_20 = arith.constant 0.353553385 : f32
    %83 = vector.broadcast %cst_20 : f32 to vector<2x8x8xf32>
    %84 = arith.mulf %82, %83 : vector<2x8x8xf32>
    %cst_21 = arith.constant -1.000000e+09 : f32
    %85 = vector.shape_cast %5 : vector<1x8x8xi1> to vector<1x8x8xi1>
    %86 = vector.broadcast %85 : vector<1x8x8xi1> to vector<2x8x8xi1>
    %87 = vector.broadcast %cst_21 : f32 to vector<2x8x8xf32>
    %88 = arith.select %86, %84, %87 : vector<2x8x8xi1>, vector<2x8x8xf32>
    %cst_22 = arith.constant dense<0xFF800000> : vector<2x8xf32>
    %89 = vector.multi_reduction <maximumf>, %88, %cst_22 [1] : vector<2x8x8xf32> to vector<2x8xf32>
    %90 = vector.shape_cast %89 : vector<2x8xf32> to vector<2x1x8xf32>
    %91 = vector.broadcast %90 : vector<2x1x8xf32> to vector<2x8x8xf32>
    %92 = arith.subf %88, %91 : vector<2x8x8xf32>
    %93 = math.exp %92 : vector<2x8x8xf32>
    %cst_23 = arith.constant dense<0.000000e+00> : vector<2x8xf32>
    %94 = vector.multi_reduction <add>, %93, %cst_23 [1] : vector<2x8x8xf32> to vector<2x8xf32>
    %95 = vector.shape_cast %94 : vector<2x8xf32> to vector<2x1x8xf32>
    %96 = tpu.reciprocal %95 {approx = true} : vector<2x1x8xf32> -> vector<2x1x8xf32>
    %97 = vector.broadcast %96 : vector<2x1x8xf32> to vector<2x8x8xf32>
    %98 = arith.mulf %93, %97 : vector<2x8x8xf32>
    %99 = arith.truncf %98 : vector<2x8x8xf32> to vector<2x8x8xbf16>
    %cst_24 = arith.constant dense<0.000000e+00> : vector<2x8x8xf32>
    %100 = tpu.matmul %99, %81, %cst_24 {dimension_numbers = #tpu.dot_dimension_numbers<[2], [1], [1], [2], [0, 0, 0, 1, 1, 2], [0], [0]>} : vector<2x8x8xbf16>, vector<2x8x8xbf16>, vector<2x8x8xf32> -> vector<2x8x8xf32>
    %101 = vector.shape_cast %100 : vector<2x8x8xf32> to vector<16x8xf32>
    %102 = vector.extract_strided_slice %13 {offsets = [0, 24], sizes = [16, 8], strides = [1, 1]} : vector<16x32xf32> to vector<16x8xf32>
    %103 = vector.shape_cast %102 : vector<16x8xf32> to vector<2x8x8xf32>
    %104 = arith.truncf %103 : vector<2x8x8xf32> to vector<2x8x8xbf16>
    %105 = vector.extract_strided_slice %12 {offsets = [0, 24], sizes = [16, 8], strides = [1, 1]} : vector<16x32xf32> to vector<16x8xf32>
    %106 = vector.shape_cast %105 : vector<16x8xf32> to vector<2x8x8xf32>
    %107 = arith.truncf %106 : vector<2x8x8xf32> to vector<2x8x8xbf16>
    %108 = vector.extract_strided_slice %14 {offsets = [0, 24], sizes = [16, 8], strides = [1, 1]} : vector<16x32xf32> to vector<16x8xf32>
    %109 = vector.shape_cast %108 : vector<16x8xf32> to vector<2x8x8xf32>
    %110 = arith.truncf %109 : vector<2x8x8xf32> to vector<2x8x8xbf16>
    %cst_25 = arith.constant dense<0.000000e+00> : vector<2x8x8xf32>
    %111 = tpu.matmul %104, %107, %cst_25 {dimension_numbers = #tpu.dot_dimension_numbers<[2], [2], [1], [1], [0, 0, 0, 1, 1, 1], [0], [0]>} : vector<2x8x8xbf16>, vector<2x8x8xbf16>, vector<2x8x8xf32> -> vector<2x8x8xf32>
    %cst_26 = arith.constant 0.353553385 : f32
    %112 = vector.broadcast %cst_26 : f32 to vector<2x8x8xf32>
    %113 = arith.mulf %111, %112 : vector<2x8x8xf32>
    %cst_27 = arith.constant -1.000000e+09 : f32
    %114 = vector.shape_cast %5 : vector<1x8x8xi1> to vector<1x8x8xi1>
    %115 = vector.broadcast %114 : vector<1x8x8xi1> to vector<2x8x8xi1>
    %116 = vector.broadcast %cst_27 : f32 to vector<2x8x8xf32>
    %117 = arith.select %115, %113, %116 : vector<2x8x8xi1>, vector<2x8x8xf32>
    %cst_28 = arith.constant dense<0xFF800000> : vector<2x8xf32>
    %118 = vector.multi_reduction <maximumf>, %117, %cst_28 [1] : vector<2x8x8xf32> to vector<2x8xf32>
    %119 = vector.shape_cast %118 : vector<2x8xf32> to vector<2x1x8xf32>
    %120 = vector.broadcast %119 : vector<2x1x8xf32> to vector<2x8x8xf32>
    %121 = arith.subf %117, %120 : vector<2x8x8xf32>
    %122 = math.exp %121 : vector<2x8x8xf32>
    %cst_29 = arith.constant dense<0.000000e+00> : vector<2x8xf32>
    %123 = vector.multi_reduction <add>, %122, %cst_29 [1] : vector<2x8x8xf32> to vector<2x8xf32>
    %124 = vector.shape_cast %123 : vector<2x8xf32> to vector<2x1x8xf32>
    %125 = tpu.reciprocal %124 {approx = true} : vector<2x1x8xf32> -> vector<2x1x8xf32>
    %126 = vector.broadcast %125 : vector<2x1x8xf32> to vector<2x8x8xf32>
    %127 = arith.mulf %122, %126 : vector<2x8x8xf32>
    %128 = arith.truncf %127 : vector<2x8x8xf32> to vector<2x8x8xbf16>
    %cst_30 = arith.constant dense<0.000000e+00> : vector<2x8x8xf32>
    %129 = tpu.matmul %128, %110, %cst_30 {dimension_numbers = #tpu.dot_dimension_numbers<[2], [1], [1], [2], [0, 0, 0, 1, 1, 2], [0], [0]>} : vector<2x8x8xbf16>, vector<2x8x8xbf16>, vector<2x8x8xf32> -> vector<2x8x8xf32>
    %130 = vector.shape_cast %129 : vector<2x8x8xf32> to vector<16x8xf32>
    %131 = tpu.concatenate %43, %72, %101, %130 in 1 : vector<16x8xf32>, vector<16x8xf32>, vector<16x8xf32>, vector<16x8xf32> -> vector<16x32xf32>
    %132 = arith.truncf %131 : vector<16x32xf32> to vector<16x32xbf16>
    %c0_31 = arith.constant 0 : index
    %c0_32 = arith.constant 0 : index
    %c0_33 = arith.constant 0 : index
    %133 = vector.load %arg8[%c0_31, %c0_32, %c0_33] : memref<4x32x32xbf16, #tpu.memory_space<vmem>>, vector<1x32x32xbf16>
    %134 = vector.shape_cast %133 : vector<1x32x32xbf16> to vector<32x32xbf16>
    %cst_34 = arith.constant dense<0.000000e+00> : vector<16x32xf32>
    %135 = tpu.matmul %132, %134, %cst_34 {dimension_numbers = #tpu.dot_dimension_numbers<[1], [0], [0], [1], [0, 0, 1, 1], [], []>} : vector<16x32xbf16>, vector<32x32xbf16>, vector<16x32xf32> -> vector<16x32xf32>
    %c0_35 = arith.constant 0 : index
    %c0_36 = arith.constant 0 : index
    %136 = vector.load %arg9[%c0_35, %c0_36] : memref<10x32xf32, #tpu.memory_space<vmem>>, vector<1x32xf32>
    %137 = vector.broadcast %136 : vector<1x32xf32> to vector<16x32xf32>
    %138 = arith.addf %135, %137 : vector<16x32xf32>
    %139 = arith.addf %0, %138 : vector<16x32xf32>
    %cst_37 = arith.constant dense<0.000000e+00> : vector<16xf32>
    %140 = vector.multi_reduction <add>, %139, %cst_37 [1] : vector<16x32xf32> to vector<16xf32>
    %141 = vector.shape_cast %140 : vector<16xf32> to vector<16x1xf32>
    %cst_38 = arith.constant 3.200000e+01 : f32
    %142 = vector.broadcast %cst_38 : f32 to vector<16x1xf32>
    %143 = arith.divf %141, %142 : vector<16x1xf32>
    %144 = vector.broadcast %143 : vector<16x1xf32> to vector<16x32xf32>
    %145 = arith.subf %139, %144 : vector<16x32xf32>
    %146 = arith.mulf %145, %145 : vector<16x32xf32>
    %cst_39 = arith.constant dense<0.000000e+00> : vector<16xf32>
    %147 = vector.multi_reduction <add>, %146, %cst_39 [1] : vector<16x32xf32> to vector<16xf32>
    %148 = vector.shape_cast %147 : vector<16xf32> to vector<16x1xf32>
    %cst_40 = arith.constant 3.200000e+01 : f32
    %149 = vector.broadcast %cst_40 : f32 to vector<16x1xf32>
    %150 = arith.divf %148, %149 : vector<16x1xf32>
    %151 = vector.broadcast %143 : vector<16x1xf32> to vector<16x32xf32>
    %152 = arith.subf %139, %151 : vector<16x32xf32>
    %cst_41 = arith.constant 9.99999974E-6 : f32
    %153 = vector.broadcast %cst_41 : f32 to vector<16x1xf32>
    %154 = arith.addf %150, %153 : vector<16x1xf32>
    %155 = math.rsqrt %154 : vector<16x1xf32>
    %156 = vector.broadcast %155 : vector<16x1xf32> to vector<16x32xf32>
    %157 = arith.mulf %152, %156 : vector<16x32xf32>
    %c4 = arith.constant 4 : index
    %c0_42 = arith.constant 0 : index
    %158 = vector.load %arg9[%c4, %c0_42] : memref<10x32xf32, #tpu.memory_space<vmem>>, vector<1x32xf32>
    %159 = vector.broadcast %158 : vector<1x32xf32> to vector<16x32xf32>
    %160 = arith.mulf %157, %159 : vector<16x32xf32>
    %c5 = arith.constant 5 : index
    %c0_43 = arith.constant 0 : index
    %161 = vector.load %arg9[%c5, %c0_43] : memref<10x32xf32, #tpu.memory_space<vmem>>, vector<1x32xf32>
    %162 = vector.broadcast %161 : vector<1x32xf32> to vector<16x32xf32>
    %163 = arith.addf %160, %162 : vector<16x32xf32>
    %164 = arith.truncf %163 : vector<16x32xf32> to vector<16x32xbf16>
    %c0_44 = arith.constant 0 : index
    %c0_45 = arith.constant 0 : index
    %165 = vector.load %arg4[%c0_44, %c0_45] : memref<32x64xbf16, #tpu.memory_space<vmem>>, vector<32x64xbf16>
    %cst_46 = arith.constant dense<0.000000e+00> : vector<16x64xf32>
    %166 = tpu.matmul %164, %165, %cst_46 {dimension_numbers = #tpu.dot_dimension_numbers<[1], [0], [0], [1], [0, 0, 1, 1], [], []>} : vector<16x32xbf16>, vector<32x64xbf16>, vector<16x64xf32> -> vector<16x64xf32>
    %c0_47 = arith.constant 0 : index
    %c0_48 = arith.constant 0 : index
    %167 = vector.load %arg5[%c0_47, %c0_48] : memref<1x64xf32, #tpu.memory_space<vmem>>, vector<1x64xf32>
    %168 = vector.broadcast %167 : vector<1x64xf32> to vector<16x64xf32>
    %169 = arith.addf %166, %168 : vector<16x64xf32>
    %170 = arith.truncf %1 : vector<16x32xf32> to vector<16x32xbf16>
    %c0_49 = arith.constant 0 : index
    %c0_50 = arith.constant 0 : index
    %171 = vector.load %arg6[%c0_49, %c0_50] : memref<32x32xbf16, #tpu.memory_space<vmem>>, vector<32x32xbf16>
    %cst_51 = arith.constant dense<0.000000e+00> : vector<16x32xf32>
    %172 = tpu.matmul %170, %171, %cst_51 {dimension_numbers = #tpu.dot_dimension_numbers<[1], [0], [0], [1], [0, 0, 1, 1], [], []>} : vector<16x32xbf16>, vector<32x32xbf16>, vector<16x32xf32> -> vector<16x32xf32>
    %c0_52 = arith.constant 0 : index
    %c0_53 = arith.constant 0 : index
    %173 = vector.load %arg7[%c0_52, %c0_53] : memref<1x32xf32, #tpu.memory_space<vmem>>, vector<1x32xf32>
    %174 = vector.broadcast %173 : vector<1x32xf32> to vector<16x32xf32>
    %175 = arith.addf %172, %174 : vector<16x32xf32>
    %176 = vector.extract_strided_slice %169 {offsets = [0, 0], sizes = [16, 32], strides = [1, 1]} : vector<16x64xf32> to vector<16x32xf32>
    %177 = vector.extract_strided_slice %169 {offsets = [0, 32], sizes = [16, 32], strides = [1, 1]} : vector<16x64xf32> to vector<16x32xf32>
    %178 = vector.extract_strided_slice %175 {offsets = [0, 0], sizes = [16, 8], strides = [1, 1]} : vector<16x32xf32> to vector<16x8xf32>
    %179 = vector.shape_cast %178 : vector<16x8xf32> to vector<2x8x8xf32>
    %180 = arith.truncf %179 : vector<2x8x8xf32> to vector<2x8x8xbf16>
    %181 = vector.extract_strided_slice %176 {offsets = [0, 0], sizes = [16, 8], strides = [1, 1]} : vector<16x32xf32> to vector<16x8xf32>
    %182 = vector.shape_cast %181 : vector<16x8xf32> to vector<2x8x8xf32>
    %183 = arith.truncf %182 : vector<2x8x8xf32> to vector<2x8x8xbf16>
    %184 = vector.extract_strided_slice %177 {offsets = [0, 0], sizes = [16, 8], strides = [1, 1]} : vector<16x32xf32> to vector<16x8xf32>
    %185 = vector.shape_cast %184 : vector<16x8xf32> to vector<2x8x8xf32>
    %186 = arith.truncf %185 : vector<2x8x8xf32> to vector<2x8x8xbf16>
    %cst_54 = arith.constant dense<0.000000e+00> : vector<2x8x8xf32>
    %187 = tpu.matmul %180, %183, %cst_54 {dimension_numbers = #tpu.dot_dimension_numbers<[2], [2], [1], [1], [0, 0, 0, 1, 1, 1], [0], [0]>} : vector<2x8x8xbf16>, vector<2x8x8xbf16>, vector<2x8x8xf32> -> vector<2x8x8xf32>
    %cst_55 = arith.constant 0.353553385 : f32
    %188 = vector.broadcast %cst_55 : f32 to vector<2x8x8xf32>
    %189 = arith.mulf %187, %188 : vector<2x8x8xf32>
    %cst_56 = arith.constant -1.000000e+09 : f32
    %190 = vector.shape_cast %5 : vector<1x8x8xi1> to vector<1x8x8xi1>
    %191 = vector.broadcast %190 : vector<1x8x8xi1> to vector<2x8x8xi1>
    %192 = vector.broadcast %cst_56 : f32 to vector<2x8x8xf32>
    %193 = arith.select %191, %189, %192 : vector<2x8x8xi1>, vector<2x8x8xf32>
    %cst_57 = arith.constant dense<0xFF800000> : vector<2x8xf32>
    %194 = vector.multi_reduction <maximumf>, %193, %cst_57 [1] : vector<2x8x8xf32> to vector<2x8xf32>
    %195 = vector.shape_cast %194 : vector<2x8xf32> to vector<2x1x8xf32>
    %196 = vector.broadcast %195 : vector<2x1x8xf32> to vector<2x8x8xf32>
    %197 = arith.subf %193, %196 : vector<2x8x8xf32>
    %198 = math.exp %197 : vector<2x8x8xf32>
    %cst_58 = arith.constant dense<0.000000e+00> : vector<2x8xf32>
    %199 = vector.multi_reduction <add>, %198, %cst_58 [1] : vector<2x8x8xf32> to vector<2x8xf32>
    %200 = vector.shape_cast %199 : vector<2x8xf32> to vector<2x1x8xf32>
    %201 = tpu.reciprocal %200 {approx = true} : vector<2x1x8xf32> -> vector<2x1x8xf32>
    %202 = vector.broadcast %201 : vector<2x1x8xf32> to vector<2x8x8xf32>
    %203 = arith.mulf %198, %202 : vector<2x8x8xf32>
    %204 = arith.truncf %203 : vector<2x8x8xf32> to vector<2x8x8xbf16>
    %cst_59 = arith.constant dense<0.000000e+00> : vector<2x8x8xf32>
    %205 = tpu.matmul %204, %186, %cst_59 {dimension_numbers = #tpu.dot_dimension_numbers<[2], [1], [1], [2], [0, 0, 0, 1, 1, 2], [0], [0]>} : vector<2x8x8xbf16>, vector<2x8x8xbf16>, vector<2x8x8xf32> -> vector<2x8x8xf32>
    %206 = vector.shape_cast %205 : vector<2x8x8xf32> to vector<16x8xf32>
    %207 = vector.extract_strided_slice %175 {offsets = [0, 8], sizes = [16, 8], strides = [1, 1]} : vector<16x32xf32> to vector<16x8xf32>
    %208 = vector.shape_cast %207 : vector<16x8xf32> to vector<2x8x8xf32>
    %209 = arith.truncf %208 : vector<2x8x8xf32> to vector<2x8x8xbf16>
    %210 = vector.extract_strided_slice %176 {offsets = [0, 8], sizes = [16, 8], strides = [1, 1]} : vector<16x32xf32> to vector<16x8xf32>
    %211 = vector.shape_cast %210 : vector<16x8xf32> to vector<2x8x8xf32>
    %212 = arith.truncf %211 : vector<2x8x8xf32> to vector<2x8x8xbf16>
    %213 = vector.extract_strided_slice %177 {offsets = [0, 8], sizes = [16, 8], strides = [1, 1]} : vector<16x32xf32> to vector<16x8xf32>
    %214 = vector.shape_cast %213 : vector<16x8xf32> to vector<2x8x8xf32>
    %215 = arith.truncf %214 : vector<2x8x8xf32> to vector<2x8x8xbf16>
    %cst_60 = arith.constant dense<0.000000e+00> : vector<2x8x8xf32>
    %216 = tpu.matmul %209, %212, %cst_60 {dimension_numbers = #tpu.dot_dimension_numbers<[2], [2], [1], [1], [0, 0, 0, 1, 1, 1], [0], [0]>} : vector<2x8x8xbf16>, vector<2x8x8xbf16>, vector<2x8x8xf32> -> vector<2x8x8xf32>
    %cst_61 = arith.constant 0.353553385 : f32
    %217 = vector.broadcast %cst_61 : f32 to vector<2x8x8xf32>
    %218 = arith.mulf %216, %217 : vector<2x8x8xf32>
    %cst_62 = arith.constant -1.000000e+09 : f32
    %219 = vector.shape_cast %5 : vector<1x8x8xi1> to vector<1x8x8xi1>
    %220 = vector.broadcast %219 : vector<1x8x8xi1> to vector<2x8x8xi1>
    %221 = vector.broadcast %cst_62 : f32 to vector<2x8x8xf32>
    %222 = arith.select %220, %218, %221 : vector<2x8x8xi1>, vector<2x8x8xf32>
    %cst_63 = arith.constant dense<0xFF800000> : vector<2x8xf32>
    %223 = vector.multi_reduction <maximumf>, %222, %cst_63 [1] : vector<2x8x8xf32> to vector<2x8xf32>
    %224 = vector.shape_cast %223 : vector<2x8xf32> to vector<2x1x8xf32>
    %225 = vector.broadcast %224 : vector<2x1x8xf32> to vector<2x8x8xf32>
    %226 = arith.subf %222, %225 : vector<2x8x8xf32>
    %227 = math.exp %226 : vector<2x8x8xf32>
    %cst_64 = arith.constant dense<0.000000e+00> : vector<2x8xf32>
    %228 = vector.multi_reduction <add>, %227, %cst_64 [1] : vector<2x8x8xf32> to vector<2x8xf32>
    %229 = vector.shape_cast %228 : vector<2x8xf32> to vector<2x1x8xf32>
    %230 = tpu.reciprocal %229 {approx = true} : vector<2x1x8xf32> -> vector<2x1x8xf32>
    %231 = vector.broadcast %230 : vector<2x1x8xf32> to vector<2x8x8xf32>
    %232 = arith.mulf %227, %231 : vector<2x8x8xf32>
    %233 = arith.truncf %232 : vector<2x8x8xf32> to vector<2x8x8xbf16>
    %cst_65 = arith.constant dense<0.000000e+00> : vector<2x8x8xf32>
    %234 = tpu.matmul %233, %215, %cst_65 {dimension_numbers = #tpu.dot_dimension_numbers<[2], [1], [1], [2], [0, 0, 0, 1, 1, 2], [0], [0]>} : vector<2x8x8xbf16>, vector<2x8x8xbf16>, vector<2x8x8xf32> -> vector<2x8x8xf32>
    %235 = vector.shape_cast %234 : vector<2x8x8xf32> to vector<16x8xf32>
    %236 = vector.extract_strided_slice %175 {offsets = [0, 16], sizes = [16, 8], strides = [1, 1]} : vector<16x32xf32> to vector<16x8xf32>
    %237 = vector.shape_cast %236 : vector<16x8xf32> to vector<2x8x8xf32>
    %238 = arith.truncf %237 : vector<2x8x8xf32> to vector<2x8x8xbf16>
    %239 = vector.extract_strided_slice %176 {offsets = [0, 16], sizes = [16, 8], strides = [1, 1]} : vector<16x32xf32> to vector<16x8xf32>
    %240 = vector.shape_cast %239 : vector<16x8xf32> to vector<2x8x8xf32>
    %241 = arith.truncf %240 : vector<2x8x8xf32> to vector<2x8x8xbf16>
    %242 = vector.extract_strided_slice %177 {offsets = [0, 16], sizes = [16, 8], strides = [1, 1]} : vector<16x32xf32> to vector<16x8xf32>
    %243 = vector.shape_cast %242 : vector<16x8xf32> to vector<2x8x8xf32>
    %244 = arith.truncf %243 : vector<2x8x8xf32> to vector<2x8x8xbf16>
    %cst_66 = arith.constant dense<0.000000e+00> : vector<2x8x8xf32>
    %245 = tpu.matmul %238, %241, %cst_66 {dimension_numbers = #tpu.dot_dimension_numbers<[2], [2], [1], [1], [0, 0, 0, 1, 1, 1], [0], [0]>} : vector<2x8x8xbf16>, vector<2x8x8xbf16>, vector<2x8x8xf32> -> vector<2x8x8xf32>
    %cst_67 = arith.constant 0.353553385 : f32
    %246 = vector.broadcast %cst_67 : f32 to vector<2x8x8xf32>
    %247 = arith.mulf %245, %246 : vector<2x8x8xf32>
    %cst_68 = arith.constant -1.000000e+09 : f32
    %248 = vector.shape_cast %5 : vector<1x8x8xi1> to vector<1x8x8xi1>
    %249 = vector.broadcast %248 : vector<1x8x8xi1> to vector<2x8x8xi1>
    %250 = vector.broadcast %cst_68 : f32 to vector<2x8x8xf32>
    %251 = arith.select %249, %247, %250 : vector<2x8x8xi1>, vector<2x8x8xf32>
    %cst_69 = arith.constant dense<0xFF800000> : vector<2x8xf32>
    %252 = vector.multi_reduction <maximumf>, %251, %cst_69 [1] : vector<2x8x8xf32> to vector<2x8xf32>
    %253 = vector.shape_cast %252 : vector<2x8xf32> to vector<2x1x8xf32>
    %254 = vector.broadcast %253 : vector<2x1x8xf32> to vector<2x8x8xf32>
    %255 = arith.subf %251, %254 : vector<2x8x8xf32>
    %256 = math.exp %255 : vector<2x8x8xf32>
    %cst_70 = arith.constant dense<0.000000e+00> : vector<2x8xf32>
    %257 = vector.multi_reduction <add>, %256, %cst_70 [1] : vector<2x8x8xf32> to vector<2x8xf32>
    %258 = vector.shape_cast %257 : vector<2x8xf32> to vector<2x1x8xf32>
    %259 = tpu.reciprocal %258 {approx = true} : vector<2x1x8xf32> -> vector<2x1x8xf32>
    %260 = vector.broadcast %259 : vector<2x1x8xf32> to vector<2x8x8xf32>
    %261 = arith.mulf %256, %260 : vector<2x8x8xf32>
    %262 = arith.truncf %261 : vector<2x8x8xf32> to vector<2x8x8xbf16>
    %cst_71 = arith.constant dense<0.000000e+00> : vector<2x8x8xf32>
    %263 = tpu.matmul %262, %244, %cst_71 {dimension_numbers = #tpu.dot_dimension_numbers<[2], [1], [1], [2], [0, 0, 0, 1, 1, 2], [0], [0]>} : vector<2x8x8xbf16>, vector<2x8x8xbf16>, vector<2x8x8xf32> -> vector<2x8x8xf32>
    %264 = vector.shape_cast %263 : vector<2x8x8xf32> to vector<16x8xf32>
    %265 = vector.extract_strided_slice %175 {offsets = [0, 24], sizes = [16, 8], strides = [1, 1]} : vector<16x32xf32> to vector<16x8xf32>
    %266 = vector.shape_cast %265 : vector<16x8xf32> to vector<2x8x8xf32>
    %267 = arith.truncf %266 : vector<2x8x8xf32> to vector<2x8x8xbf16>
    %268 = vector.extract_strided_slice %176 {offsets = [0, 24], sizes = [16, 8], strides = [1, 1]} : vector<16x32xf32> to vector<16x8xf32>
    %269 = vector.shape_cast %268 : vector<16x8xf32> to vector<2x8x8xf32>
    %270 = arith.truncf %269 : vector<2x8x8xf32> to vector<2x8x8xbf16>
    %271 = vector.extract_strided_slice %177 {offsets = [0, 24], sizes = [16, 8], strides = [1, 1]} : vector<16x32xf32> to vector<16x8xf32>
    %272 = vector.shape_cast %271 : vector<16x8xf32> to vector<2x8x8xf32>
    %273 = arith.truncf %272 : vector<2x8x8xf32> to vector<2x8x8xbf16>
    %cst_72 = arith.constant dense<0.000000e+00> : vector<2x8x8xf32>
    %274 = tpu.matmul %267, %270, %cst_72 {dimension_numbers = #tpu.dot_dimension_numbers<[2], [2], [1], [1], [0, 0, 0, 1, 1, 1], [0], [0]>} : vector<2x8x8xbf16>, vector<2x8x8xbf16>, vector<2x8x8xf32> -> vector<2x8x8xf32>
    %cst_73 = arith.constant 0.353553385 : f32
    %275 = vector.broadcast %cst_73 : f32 to vector<2x8x8xf32>
    %276 = arith.mulf %274, %275 : vector<2x8x8xf32>
    %cst_74 = arith.constant -1.000000e+09 : f32
    %277 = vector.shape_cast %5 : vector<1x8x8xi1> to vector<1x8x8xi1>
    %278 = vector.broadcast %277 : vector<1x8x8xi1> to vector<2x8x8xi1>
    %279 = vector.broadcast %cst_74 : f32 to vector<2x8x8xf32>
    %280 = arith.select %278, %276, %279 : vector<2x8x8xi1>, vector<2x8x8xf32>
    %cst_75 = arith.constant dense<0xFF800000> : vector<2x8xf32>
    %281 = vector.multi_reduction <maximumf>, %280, %cst_75 [1] : vector<2x8x8xf32> to vector<2x8xf32>
    %282 = vector.shape_cast %281 : vector<2x8xf32> to vector<2x1x8xf32>
    %283 = vector.broadcast %282 : vector<2x1x8xf32> to vector<2x8x8xf32>
    %284 = arith.subf %280, %283 : vector<2x8x8xf32>
    %285 = math.exp %284 : vector<2x8x8xf32>
    %cst_76 = arith.constant dense<0.000000e+00> : vector<2x8xf32>
    %286 = vector.multi_reduction <add>, %285, %cst_76 [1] : vector<2x8x8xf32> to vector<2x8xf32>
    %287 = vector.shape_cast %286 : vector<2x8xf32> to vector<2x1x8xf32>
    %288 = tpu.reciprocal %287 {approx = true} : vector<2x1x8xf32> -> vector<2x1x8xf32>
    %289 = vector.broadcast %288 : vector<2x1x8xf32> to vector<2x8x8xf32>
    %290 = arith.mulf %285, %289 : vector<2x8x8xf32>
    %291 = arith.truncf %290 : vector<2x8x8xf32> to vector<2x8x8xbf16>
    %cst_77 = arith.constant dense<0.000000e+00> : vector<2x8x8xf32>
    %292 = tpu.matmul %291, %273, %cst_77 {dimension_numbers = #tpu.dot_dimension_numbers<[2], [1], [1], [2], [0, 0, 0, 1, 1, 2], [0], [0]>} : vector<2x8x8xbf16>, vector<2x8x8xbf16>, vector<2x8x8xf32> -> vector<2x8x8xf32>
    %293 = vector.shape_cast %292 : vector<2x8x8xf32> to vector<16x8xf32>
    %294 = tpu.concatenate %206, %235, %264, %293 in 1 : vector<16x8xf32>, vector<16x8xf32>, vector<16x8xf32>, vector<16x8xf32> -> vector<16x32xf32>
    %295 = arith.truncf %294 : vector<16x32xf32> to vector<16x32xbf16>
    %c1 = arith.constant 1 : index
    %c0_78 = arith.constant 0 : index
    %c0_79 = arith.constant 0 : index
    %296 = vector.load %arg8[%c1, %c0_78, %c0_79] : memref<4x32x32xbf16, #tpu.memory_space<vmem>>, vector<1x32x32xbf16>
    %297 = vector.shape_cast %296 : vector<1x32x32xbf16> to vector<32x32xbf16>
    %cst_80 = arith.constant dense<0.000000e+00> : vector<16x32xf32>
    %298 = tpu.matmul %295, %297, %cst_80 {dimension_numbers = #tpu.dot_dimension_numbers<[1], [0], [0], [1], [0, 0, 1, 1], [], []>} : vector<16x32xbf16>, vector<32x32xbf16>, vector<16x32xf32> -> vector<16x32xf32>
    %c1_81 = arith.constant 1 : index
    %c0_82 = arith.constant 0 : index
    %299 = vector.load %arg9[%c1_81, %c0_82] : memref<10x32xf32, #tpu.memory_space<vmem>>, vector<1x32xf32>
    %300 = vector.broadcast %299 : vector<1x32xf32> to vector<16x32xf32>
    %301 = arith.addf %298, %300 : vector<16x32xf32>
    %302 = arith.addf %1, %301 : vector<16x32xf32>
    %cst_83 = arith.constant dense<0.000000e+00> : vector<16xf32>
    %303 = vector.multi_reduction <add>, %302, %cst_83 [1] : vector<16x32xf32> to vector<16xf32>
    %304 = vector.shape_cast %303 : vector<16xf32> to vector<16x1xf32>
    %cst_84 = arith.constant 3.200000e+01 : f32
    %305 = vector.broadcast %cst_84 : f32 to vector<16x1xf32>
    %306 = arith.divf %304, %305 : vector<16x1xf32>
    %307 = vector.broadcast %306 : vector<16x1xf32> to vector<16x32xf32>
    %308 = arith.subf %302, %307 : vector<16x32xf32>
    %309 = arith.mulf %308, %308 : vector<16x32xf32>
    %cst_85 = arith.constant dense<0.000000e+00> : vector<16xf32>
    %310 = vector.multi_reduction <add>, %309, %cst_85 [1] : vector<16x32xf32> to vector<16xf32>
    %311 = vector.shape_cast %310 : vector<16xf32> to vector<16x1xf32>
    %cst_86 = arith.constant 3.200000e+01 : f32
    %312 = vector.broadcast %cst_86 : f32 to vector<16x1xf32>
    %313 = arith.divf %311, %312 : vector<16x1xf32>
    %314 = vector.broadcast %306 : vector<16x1xf32> to vector<16x32xf32>
    %315 = arith.subf %302, %314 : vector<16x32xf32>
    %cst_87 = arith.constant 9.99999974E-6 : f32
    %316 = vector.broadcast %cst_87 : f32 to vector<16x1xf32>
    %317 = arith.addf %313, %316 : vector<16x1xf32>
    %318 = math.rsqrt %317 : vector<16x1xf32>
    %319 = vector.broadcast %318 : vector<16x1xf32> to vector<16x32xf32>
    %320 = arith.mulf %315, %319 : vector<16x32xf32>
    %c6 = arith.constant 6 : index
    %c0_88 = arith.constant 0 : index
    %321 = vector.load %arg9[%c6, %c0_88] : memref<10x32xf32, #tpu.memory_space<vmem>>, vector<1x32xf32>
    %322 = vector.broadcast %321 : vector<1x32xf32> to vector<16x32xf32>
    %323 = arith.mulf %320, %322 : vector<16x32xf32>
    %c7 = arith.constant 7 : index
    %c0_89 = arith.constant 0 : index
    %324 = vector.load %arg9[%c7, %c0_89] : memref<10x32xf32, #tpu.memory_space<vmem>>, vector<1x32xf32>
    %325 = vector.broadcast %324 : vector<1x32xf32> to vector<16x32xf32>
    %326 = arith.addf %323, %325 : vector<16x32xf32>
    %327 = arith.truncf %326 : vector<16x32xf32> to vector<16x32xbf16>
    %c2 = arith.constant 2 : index
    %c0_90 = arith.constant 0 : index
    %c0_91 = arith.constant 0 : index
    %328 = vector.load %arg8[%c2, %c0_90, %c0_91] : memref<4x32x32xbf16, #tpu.memory_space<vmem>>, vector<1x32x32xbf16>
    %329 = vector.shape_cast %328 : vector<1x32x32xbf16> to vector<32x32xbf16>
    %cst_92 = arith.constant dense<0.000000e+00> : vector<16x32xf32>
    %330 = tpu.matmul %327, %329, %cst_92 {dimension_numbers = #tpu.dot_dimension_numbers<[1], [0], [0], [1], [0, 0, 1, 1], [], []>} : vector<16x32xbf16>, vector<32x32xbf16>, vector<16x32xf32> -> vector<16x32xf32>
    %c2_93 = arith.constant 2 : index
    %c0_94 = arith.constant 0 : index
    %331 = vector.load %arg9[%c2_93, %c0_94] : memref<10x32xf32, #tpu.memory_space<vmem>>, vector<1x32xf32>
    %332 = vector.broadcast %331 : vector<1x32xf32> to vector<16x32xf32>
    %333 = arith.addf %330, %332 : vector<16x32xf32>
    %cst_95 = arith.constant 5.000000e-01 : f32
    %334 = vector.broadcast %cst_95 : f32 to vector<16x32xf32>
    %335 = arith.mulf %334, %333 : vector<16x32xf32>
    %cst_96 = arith.constant 4.471500e-02 : f32
    %336 = vector.broadcast %cst_96 : f32 to vector<16x32xf32>
    %337 = arith.mulf %336, %333 : vector<16x32xf32>
    %338 = arith.mulf %337, %333 : vector<16x32xf32>
    %339 = arith.mulf %338, %333 : vector<16x32xf32>
    %340 = arith.addf %333, %339 : vector<16x32xf32>
    %cst_97 = arith.constant 0.797884583 : f32
    %341 = vector.broadcast %cst_97 : f32 to vector<16x32xf32>
    %342 = arith.mulf %341, %340 : vector<16x32xf32>
    %343 = math.tanh %342 : vector<16x32xf32>
    %cst_98 = arith.constant 1.000000e+00 : f32
    %344 = vector.broadcast %cst_98 : f32 to vector<16x32xf32>
    %345 = arith.addf %344, %343 : vector<16x32xf32>
    %346 = arith.mulf %335, %345 : vector<16x32xf32>
    %347 = arith.truncf %346 : vector<16x32xf32> to vector<16x32xbf16>
    %c3 = arith.constant 3 : index
    %c0_99 = arith.constant 0 : index
    %c0_100 = arith.constant 0 : index
    %348 = vector.load %arg8[%c3, %c0_99, %c0_100] : memref<4x32x32xbf16, #tpu.memory_space<vmem>>, vector<1x32x32xbf16>
    %349 = vector.shape_cast %348 : vector<1x32x32xbf16> to vector<32x32xbf16>
    %cst_101 = arith.constant dense<0.000000e+00> : vector<16x32xf32>
    %350 = tpu.matmul %347, %349, %cst_101 {dimension_numbers = #tpu.dot_dimension_numbers<[1], [0], [0], [1], [0, 0, 1, 1], [], []>} : vector<16x32xbf16>, vector<32x32xbf16>, vector<16x32xf32> -> vector<16x32xf32>
    %c3_102 = arith.constant 3 : index
    %c0_103 = arith.constant 0 : index
    %351 = vector.load %arg9[%c3_102, %c0_103] : memref<10x32xf32, #tpu.memory_space<vmem>>, vector<1x32xf32>
    %352 = vector.broadcast %351 : vector<1x32xf32> to vector<16x32xf32>
    %353 = arith.addf %350, %352 : vector<16x32xf32>
    %354 = arith.addf %326, %353 : vector<16x32xf32>
    %cst_104 = arith.constant dense<0.000000e+00> : vector<16xf32>
    %355 = vector.multi_reduction <add>, %354, %cst_104 [1] : vector<16x32xf32> to vector<16xf32>
    %356 = vector.shape_cast %355 : vector<16xf32> to vector<16x1xf32>
    %cst_105 = arith.constant 3.200000e+01 : f32
    %357 = vector.broadcast %cst_105 : f32 to vector<16x1xf32>
    %358 = arith.divf %356, %357 : vector<16x1xf32>
    %359 = vector.broadcast %358 : vector<16x1xf32> to vector<16x32xf32>
    %360 = arith.subf %354, %359 : vector<16x32xf32>
    %361 = arith.mulf %360, %360 : vector<16x32xf32>
    %cst_106 = arith.constant dense<0.000000e+00> : vector<16xf32>
    %362 = vector.multi_reduction <add>, %361, %cst_106 [1] : vector<16x32xf32> to vector<16xf32>
    %363 = vector.shape_cast %362 : vector<16xf32> to vector<16x1xf32>
    %cst_107 = arith.constant 3.200000e+01 : f32
    %364 = vector.broadcast %cst_107 : f32 to vector<16x1xf32>
    %365 = arith.divf %363, %364 : vector<16x1xf32>
    %366 = vector.broadcast %358 : vector<16x1xf32> to vector<16x32xf32>
    %367 = arith.subf %354, %366 : vector<16x32xf32>
    %cst_108 = arith.constant 9.99999974E-6 : f32
    %368 = vector.broadcast %cst_108 : f32 to vector<16x1xf32>
    %369 = arith.addf %365, %368 : vector<16x1xf32>
    %370 = math.rsqrt %369 : vector<16x1xf32>
    %371 = vector.broadcast %370 : vector<16x1xf32> to vector<16x32xf32>
    %372 = arith.mulf %367, %371 : vector<16x32xf32>
    %c8 = arith.constant 8 : index
    %c0_109 = arith.constant 0 : index
    %373 = vector.load %arg9[%c8, %c0_109] : memref<10x32xf32, #tpu.memory_space<vmem>>, vector<1x32xf32>
    %374 = vector.broadcast %373 : vector<1x32xf32> to vector<16x32xf32>
    %375 = arith.mulf %372, %374 : vector<16x32xf32>
    %c9 = arith.constant 9 : index
    %c0_110 = arith.constant 0 : index
    %376 = vector.load %arg9[%c9, %c0_110] : memref<10x32xf32, #tpu.memory_space<vmem>>, vector<1x32xf32>
    %377 = vector.broadcast %376 : vector<1x32xf32> to vector<16x32xf32>
    %378 = arith.addf %375, %377 : vector<16x32xf32>
    %c0_111 = arith.constant 0 : index
    %c0_112 = arith.constant 0 : index
    %379 = vector.load %arg10[%c0_111, %c0_112] : memref<16x32xf32, #tpu.memory_space<vmem>>, vector<16x32xf32>
    tpu.vector_store %arg10[%c0_111, %c0_112], %378 {strides = array<i32>} : memref<16x32xf32, #tpu.memory_space<vmem>>, vector<16x32xf32>,
    return
  }
}

</mosaic_0001>

<bundles_post_ra>
// kernel: tpu_custom_call.1
= control target key start
LH: loop header
LB: loop body
LE: loop exit
PB: predicated region body
PF: predicated region fallthrough
CT: control target
= control target key end

     0   :  { %15 = vsyncpa [#allocation3], 0  ;;  %s4074_s0 = inlined_call_operand.hbm [shape: f32[16,32], index: 0, kind: input, shape index: {}]   ;;  %s4075_s1 = inlined_call_operand.hbm [shape: f32[16,32], index: 1, kind: input, shape index: {}]   ;;  %s4076_s2 = inlined_call_operand.hbm [shape: bf16[32,96], index: 2, kind: input, shape index: {}]   ;;  %s4077_s3 = inlined_call_operand.hbm [shape: f32[1,96], index: 3, kind: input, shape index: {}]   ;;  %s4078_s4 = inlined_call_operand.hbm [shape: bf16[32,64], index: 4, kind: input, shape index: {}]   ;;  %s4079_s5 = inlined_call_operand.hbm [shape: f32[1,64], index: 5, kind: input, shape index: {}]   ;;  %s4080_s6 = inlined_call_operand.hbm [shape: bf16[32,32], index: 6, kind: input, shape index: {}]   ;;  %s4081_s7 = inlined_call_operand.hbm [shape: f32[1,32], index: 7, kind: input, shape index: {}]   ;;  %s4082_s8 = inlined_call_operand.hbm [shape: bf16[4,32,32], index: 8, kind: input, shape index: {}]   ;;  %s4083_s9 = inlined_call_operand.vmem [shape: f32[10,32], index: 9, kind: input, shape index: {}]   ;;  %s4084_s10 = inlined_call_operand.hbm [shape: f32[16,32], index: 10, kind: output, shape index: {}]  }
   0x1   :  { %16 = vsyncpa [#allocation6], 0 }
   0x2   :  { %17 = vsyncpa [#allocation9], 0 }
   0x3   :  { %18 = vsyncpa [#allocation12], 0 }
   0x4   :  { %19 = vsyncpa [#allocation15], 0 }
   0x5   :  { %20 = vsyncpa [#allocation4], 0  ;;  %s3551_s13 = smov [#allocation5]   ;;  %s3552_s15 = smov [#allocation8]  }
   0x6   :  { %s38_s14 = sshll.u32 %s3551_s13, 4  ;;  %s63_s16 = sshll.u32 %s3552_s15, 4  ;;  %s39_s14 = int_to_ptr.vmem [resolvable:$true] %s38_s14  ;;  %s64_s16 = int_to_ptr.vmem [resolvable:$true] %s63_s16 }
   0x7   :  { %s3347_s17 = scalar_lea.vmem %s39_s14, 256  ;;  %p3352_p1 = scmp.lt.s32.totalorder %s39_s14, %s39_s14 }
   0x8   :  { %p3348_p0 = scmp.ne.s32.totalorder %s39_s14, %s3347_s17  ;;  %p3353_p2 = scmp.lt.s32.totalorder %s3347_s17, %s3347_s17 }
   0xa   :  { %p3354_p3 = por %p3353_p2, %p3352_p1 }
   0xc   :  { %p3355_p4 = pnand %p3354_p3, %p3348_p0 }
   0xe   :  { %3358 = shalt.err (!%p3355_p4)
}
   0xf   :  { %s3553_s18 = smov 128   ;;  %s3554_s19 = smov 8  }
  0x10   :  { %44 = dma.hbm_to_vmem [thread:$0]  %s4075_s1, 256, %s39_s14, [#allocation6], %s3553_s18, %s3553_s18, %s3554_s19  }
  0x11   :  { %s3367_s22 = scalar_lea.vmem %s64_s16, 16  ;;  %s3371_s23 = scalar_lea.vmem %s64_s16, 32 }
  0x12   :  { %p3368_p5 = scmp.ne.s32.totalorder %s64_s16, %s3367_s22  ;;  %p3372_p6 = scmp.lt.s32.totalorder %s64_s16, %s64_s16 }
  0x13   :  { %p3373_p7 = scmp.lt.s32.totalorder %s3371_s23, %s3367_s22 }
  0x15   :  { %p3374_p8 = por %p3373_p7, %p3372_p6 }
  0x17   :  { %p3375_p9 = pnand %p3374_p8, %p3368_p5 }
  0x19   :  { %3378 = shalt.err (!%p3375_p9)
}
  0x1a   :  { %66 = dma.hbm_to_vmem [thread:$0]  %s4077_s3, 16, %s64_s16, [#allocation9]  }
  0x1b   :  { %s3555_s26 = smov [#allocation11]   ;;  %s3556_s28 = smov [#allocation14]  }
  0x1c   :  { %s85_s27 = sshll.u32 %s3555_s26, 4  ;;  %s107_s29 = sshll.u32 %s3556_s28, 4  ;;  %s86_s27 = int_to_ptr.vmem [resolvable:$true] %s85_s27  ;;  %s108_s29 = int_to_ptr.vmem [resolvable:$true] %s107_s29 }
  0x1d   :  { %s3387_s30 = scalar_lea.vmem %s86_s27, 16  ;;  %s3391_s1 = scalar_lea.vmem %s86_s27, 32 }
  0x1e   :  { %p3388_p10 = scmp.ne.s32.totalorder %s86_s27, %s3387_s30  ;;  %p3392_p11 = scmp.lt.s32.totalorder %s86_s27, %s86_s27 }
  0x1f   :  { %p3393_p12 = scmp.lt.s32.totalorder %s3391_s1, %s3387_s30 }
  0x21   :  { %p3394_p13 = por %p3393_p12, %p3392_p11 }
  0x23   :  { %p3395_p0 = pnand %p3394_p13, %p3388_p10 }
  0x25   :  { %3398 = shalt.err (!%p3395_p0)
}
  0x26   :  { %88 = dma.hbm_to_vmem [thread:$0]  %s4079_s5, 16, %s86_s27, [#allocation12]  }
  0x27   :  { %s3407_s13 = scalar_lea.vmem %s108_s29, 16  ;;  %s3411_s3 = scalar_lea.vmem %s108_s29, 32 }
  0x28   :  { %p3408_p1 = scmp.ne.s32.totalorder %s108_s29, %s3407_s13  ;;  %p3412_p2 = scmp.lt.s32.totalorder %s108_s29, %s108_s29 }
  0x29   :  { %p3413_p3 = scmp.lt.s32.totalorder %s3411_s3, %s3407_s13 }
  0x2b   :  { %p3414_p4 = por %p3413_p3, %p3412_p2 }
  0x2d   :  { %p3415_p5 = pnand %p3414_p4, %p3408_p1 }
  0x2f   :  { %3418 = shalt.err (!%p3415_p5)
}
  0x30   :  { %110 = dma.hbm_to_vmem [thread:$0]  %s4081_s7, 16, %s108_s29, [#allocation15]  }
  0x31   :  { %s3557_s16 = smov [#allocation2]   ;;  %s3558_s20 = smov [#allocation7]  }
  0x32   :  { %s26_s17 = sshll.u32 %s3557_s16, 4  ;;  %s50_s21 = sshll.u32 %s3558_s20, 4  ;;  %s27_s17 = int_to_ptr.vmem [resolvable:$true] %s26_s17  ;;  %s51_s21 = int_to_ptr.vmem [resolvable:$true] %s50_s21 }
  0x33   :  { %s3427_s22 = scalar_lea.vmem %s27_s17, 256  ;;  %p3432_p7 = scmp.lt.s32.totalorder %s27_s17, %s27_s17 }
  0x34   :  { %p3428_p6 = scmp.ne.s32.totalorder %s27_s17, %s3427_s22  ;;  %p3433_p8 = scmp.lt.s32.totalorder %s3427_s22, %s3427_s22 }
  0x36   :  { %p3434_p9 = por %p3433_p8, %p3432_p7 }
  0x38   :  { %p3435_p10 = pnand %p3434_p9, %p3428_p6 }
  0x3a   :  { %3438 = shalt.err (!%p3435_p10)
}
  0x3b   :  { %32 = dma.hbm_to_vmem [thread:$0]  %s4074_s0, 256, %s27_s17, [#allocation3], %s3553_s18, %s3553_s18, %s3554_s19  }
  0x3c   :  { %s3447_s7 = scalar_lea.vmem %s51_s21, 256  ;;  %p3452_p12 = scmp.lt.s32.totalorder %s51_s21, %s51_s21 }
  0x3d   :  { %p3448_p11 = scmp.ne.s32.totalorder %s51_s21, %s3447_s7  ;;  %p3453_p13 = scmp.lt.s32.totalorder %s3447_s7, %s3447_s7 }
  0x3f   :  { %p3454_p0 = por %p3453_p13, %p3452_p12 }
  0x41   :  { %p3455_p1 = pnand %p3454_p0, %p3448_p11 }
  0x43   :  { %3458 = shalt.err (!%p3455_p1)
}
  0x44   :  { %s3559_s24 = smov 64   ;;  %s3560_s25 = smov 4  }
  0x45   :  { %56 = dma.hbm_to_vmem [thread:$0]  %s4076_s2, 256, %s51_s21, [#allocation6], %s3559_s24, %s3559_s24, %s3560_s25  }
  0x46   :  { %s3561_s28 = smov [#allocation10]   ;;  %s3562_s30 = smov [#allocation13]  }
  0x47   :  { %s72_s29 = sshll.u32 %s3561_s28, 4  ;;  %s94_s0 = sshll.u32 %s3562_s30, 4  ;;  %s73_s29 = int_to_ptr.vmem [resolvable:$true] %s72_s29  ;;  %s95_s0 = int_to_ptr.vmem [resolvable:$true] %s94_s0 }
  0x48   :  { %s3467_s1 = scalar_lea.vmem %s73_s29, 256  ;;  %p3472_p3 = scmp.lt.s32.totalorder %s73_s29, %s73_s29 }
  0x49   :  { %p3468_p2 = scmp.ne.s32.totalorder %s73_s29, %s3467_s1  ;;  %p3473_p4 = scmp.lt.s32.totalorder %s3467_s1, %s3467_s1 }
  0x4b   :  { %p3474_p5 = por %p3473_p4, %p3472_p3 }
  0x4d   :  { %p3475_p6 = pnand %p3474_p5, %p3468_p2 }
  0x4f   :  { %3478 = shalt.err (!%p3475_p6)
}
  0x50   :  { %78 = dma.hbm_to_vmem [thread:$0]  %s4078_s4, 256, %s73_s29, [#allocation9], %s3559_s24, %s3559_s24, %s3560_s25  }
  0x51   :  { %s3487_s2 = scalar_lea.vmem %s95_s0, 256  ;;  %p3492_p8 = scmp.lt.s32.totalorder %s95_s0, %s95_s0 }
  0x52   :  { %p3488_p7 = scmp.ne.s32.totalorder %s95_s0, %s3487_s2  ;;  %p3493_p9 = scmp.lt.s32.totalorder %s3487_s2, %s3487_s2 }
  0x54   :  { %p3494_p10 = por %p3493_p9, %p3492_p8 }
  0x56   :  { %p3495_p11 = pnand %p3494_p10, %p3488_p7 }
  0x58   :  { %3498 = shalt.err (!%p3495_p11)
}
  0x59   :  { %100 = dma.hbm_to_vmem [thread:$0]  %s4080_s6, 256, %s95_s0, [#allocation12], %s3559_s24, %s3559_s24, %s3560_s25  }
  0x5a   :  { %s3563_s14 = smov [#allocation16]  }
  0x5b   :  { %s116_s15 = sshll.u32 %s3563_s14, 4  ;;  %s117_s15 = int_to_ptr.vmem [resolvable:$true] %s116_s15 }
  0x5c   :  { %s3507_s16 = scalar_lea.vmem %s117_s15, 1024  ;;  %p3512_p13 = scmp.lt.s32.totalorder %s117_s15, %s117_s15 }
  0x5d   :  { %p3508_p12 = scmp.ne.s32.totalorder %s117_s15, %s3507_s16  ;;  %p3513_p0 = scmp.lt.s32.totalorder %s3507_s16, %s3507_s16 }
  0x5f   :  { %p3514_p1 = por %p3513_p0, %p3512_p13 }
  0x61   :  { %p3515_p2 = pnand %p3514_p1, %p3508_p12 }
  0x63   :  { %3518 = shalt.err (!%p3515_p2)
}
  0x64   :  { %122 = dma.hbm_to_vmem [thread:$0]  %s4082_s8, 1024, %s117_s15, [#allocation15], %s3559_s24, %s3559_s24, %s3560_s25  }
  0x65   :  { %3539 = dma.done.wait [#allocation3], 256  }
  0x66   :  { %3540 = vsyncadd [#allocation3], 4294967040 }
  0x67   :  { %3541 = dma.done.wait [#allocation6], 512  }
  0x68   :  { %3542 = vsyncadd [#allocation6], 4294966784 }
  0x69   :  { %3543 = dma.done.wait [#allocation9], 272  }
  0x6a   :  { %3544 = vsyncadd [#allocation9], 4294967024 }
  0x6b   :  { %3545 = dma.done.wait [#allocation12], 272  }
  0x6c   :  { %3546 = vsyncadd [#allocation12], 4294967024 }
  0x6d   :  { %3547 = dma.done.wait [#allocation15], 1040  }
  0x6e   :  { %3548 = vsyncadd [#allocation15], 4294966256  ;;  %v3564_v0 = vmov 0.0   ;;  %vm3565_vm0 = vmmov 0   ;;  %v3245_v1 = vld [vmem:[#allocation7 + $0x8] sm:$0xff]   ;;  %v3246_v2 = vld [vmem:[#allocation7] sm:$0xff]   ;;  %v157_v23 = vlaneseq }
  0x6f   :  { %2939 = vmatprep.subr.bf16.mxu0 %v3564_v0  ;;  %2943 = vmatprep.mubr.msk.bf16.mxu0 %vm3565_vm0, %v3564_v0  ;;  %v3685_v3 = vld [vmem:[#allocation2] sm:$0xff]  ;;  %v3687_v4 = vld [vmem:[#allocation2 + $0x8] sm:$0xff]  ;;  %vm186_vm1 = vcmask 261120   ;;  %v2788_v6 = vld [vmem:[#allocation8] ss:$0 sm:$0xff]  ;;  %vm236_vm2 = vcmask 64512  }
  0x70   :  { %2947 = vmatprep.subr.bf16.mxu1 %v3564_v0  ;;  %2949 = vmatprep.mubr.msk.bf16.mxu1 %vm3565_vm0, %v3564_v0  ;;  %v162_v5 = vpack.c.bf16 %v3687_v4, %v3685_v3  ;;  %s3566_s6 = smov 96   ;;  %s3567_s8 = smov 120   ;;  %vm383_vm3 = vcmask 1043456   ;;  %v158_v24 = vshrl.u32 %v157_v23, 7  ;;  %v160_v25 = vand.u32 127, %v157_v23 }
  0x71   :  { %2940 = vmatpush3.bf16.msra.mxu0 %v3245_v1  ;;  %s3568_s20 = smov 88   ;;  %s3569_s21 = smov 56   ;;  %vm1221_vm5 = vcmask 130048   ;;  %vm1224_vm6 = vcmask 195584  }
  0x72   :  { %2941 = vmatprep.subr.bf16.mxu0 %v3564_v0  ;;  %s3570_s22 = smov 112   ;;  %s3571_s5 = smov 80   ;;  %vm3726_vm4 = vcmp.ge.s32.totalorder %v158_v24, %v160_v25 }
  0x73   :  { %s3572_s23 = smov 48   ;;  %s3573_s7 = smov 104  }
  0x74   :  { %s3575_s25 = smov 40   ;;  %s3576_s26 = smov 16  }
  0x75   :  { %2942 = vmatpush3.bf16.msra.mxu0 %v3246_v2  ;;  %s3577_s27 = smov 24  }
  0x76   :  { %2953 = vmatprep.subr.bf16.mxu0 %v3564_v0 }
  0x78   :  { %2944 = vmatmul.mubr.msk.bf16.vlgmr.msra.gmra.mxu0 %vm186_vm1, %v162_v5 }
  0x79   :  { %2955 = vmatprep.mubr.msk.bf16.mxu0 %vm3565_vm0, %v3564_v0 }
 0x138   :  { %v224_v7 = vpop.f32.mrf.mxu0 }
 0x139   :  { %v225_v8 = vadd.f32 %v2788_v6, %v224_v7 }
 0x13a   :  { %v2945_v9 = vpop.f32.mrf.mxu0 }
 0x13b   :  { %v231_v10 = vpack.c.bf16 %v225_v8, %v225_v8 }
 0x13c   :  { %v227_v11 = vpop.f32.mrf.mxu0 }
 0x13d   :  { %v228_v12 = vadd.f32 %v2788_v6, %v227_v11  ;;  %378 = vrot.lane.b32.xlu1 %v231_v10, %s3559_s24  ;;  %234 = vrot.lane.b32.xlu0 %v231_v10, %s3566_s6  ;;  %v241_v13 = vsel %vm236_vm2, %v231_v10, 0 }
 0x13e   :  { %v2946_v14 = vpop.f32.mrf.mxu0  ;;  %2948 = vmatpush3.bf16.xpose.msra.mxu1 %v241_v13 }
 0x13f   :  { %v232_v15 = vpack.c.bf16 %v228_v12, %v228_v12  ;;  %2959 = vmatprep.subr.bf16.mxu1 %v3564_v0 }
 0x141   :  { %427 = vrot.lane.b32.xlu1 %v232_v15, %s3559_s24  ;;  %284 = vrot.lane.b32.xlu0 %v232_v15, %s3566_s6  ;;  %v290_v16 = vsel %vm236_vm2, %v232_v15, 0  ;;  %s3574_s24 = smov 72  }
 0x142   :  { %2954 = vmatpush3.bf16.xpose.msra.mxu0 %v290_v16 }
 0x143   :  { %2965 = vmatprep.subr.bf16.mxu0 %v3564_v0 }
 0x145   :  { %527 = vrot.lane.b32.xlu1 %v232_v15, %s3567_s8  ;;  %477 = vrot.lane.b32.xlu0 %v231_v10, %s3567_s8 }
 0x149   :  { %525 = vrot.lane.b32.xlu1 %v232_v15, %s3568_s20  ;;  %475 = vrot.lane.b32.xlu0 %v231_v10, %s3568_s20 }
 0x14d   :  { %667 = vrot.lane.b32.xlu1 %v232_v15, %s3569_s21  ;;  %619 = vrot.lane.b32.xlu0 %v231_v10, %s3569_s21 }
 0x151   :  { %767 = vrot.lane.b32.xlu1 %v232_v15, %s3570_s22  ;;  %717 = vrot.lane.b32.xlu0 %v231_v10, %s3570_s22 }
 0x155   :  { %765 = vrot.lane.b32.xlu1 %v232_v15, %s3571_s5  ;;  %715 = vrot.lane.b32.xlu0 %v231_v10, %s3571_s5 }
 0x159   :  { %907 = vrot.lane.b32.xlu1 %v232_v15, %s3572_s23  ;;  %859 = vrot.lane.b32.xlu0 %v231_v10, %s3572_s23 }
 0x15d   :  { %1007 = vrot.lane.b32.xlu1 %v232_v15, %s3573_s7  ;;  %957 = vrot.lane.b32.xlu0 %v231_v10, %s3573_s7 }
 0x161   :  { %1005 = vrot.lane.b32.xlu1 %v232_v15, %s3574_s24  ;;  %955 = vrot.lane.b32.xlu0 %v231_v10, %s3574_s24 }
 0x165   :  { %1147 = vrot.lane.b32.xlu1 %v232_v15, %s3575_s25  ;;  %1099 = vrot.lane.b32.xlu0 %v231_v10, %s3575_s25 }
 0x1af   :  { %v379_v17 = vpop.permute.xlu1 %378  ;;  %v235_v18 = vpop.permute.xlu0 %234 }
 0x1b0   :  { %v385_v19 = vsel %vm383_vm3, %v379_v17, 0  ;;  %2950 = vmatmul.mubr.msk.bf16.vlgmr.msra.gmra.mxu1 %vm236_vm2, %v235_v18 }
 0x1b1   :  { %2960 = vmatpush3.bf16.msra.mxu1 %v385_v19  ;;  %2961 = vmatprep.mubr.msk.bf16.mxu1 %vm3565_vm0, %v3564_v0 }
 0x1b2   :  { %2971 = vmatprep.subr.bf16.mxu1 %v3564_v0 }
 0x1b3   :  { %v428_v20 = vpop.permute.xlu1 %427  ;;  %v285_v21 = vpop.permute.xlu0 %284 }
 0x1b4   :  { %v433_v22 = vsel %vm383_vm3, %v428_v20, 0  ;;  %2956 = vmatmul.mubr.msk.bf16.vlgmr.msra.gmra.mxu0 %vm236_vm2, %v285_v21 }
 0x1b5   :  { %2966 = vmatpush3.bf16.msra.mxu0 %v433_v22  ;;  %2967 = vmatprep.mubr.msk.bf16.mxu0 %vm3565_vm0, %v3564_v0 }
 0x1b6   :  { %2977 = vmatprep.subr.bf16.mxu0 %v3564_v0 }
 0x1b7   :  { %v478_v12 = vpop.permute.xlu0 %477  ;;  %v528_v15 = vpop.permute.xlu1 %527 }
 0x1b8   :  { %v483_v19 = vsel %vm236_vm2, %v478_v12, 0  ;;  %v533_v23 = vsel %vm236_vm2, %v528_v15, 0 }
 0x1bb   :  { %v476_v18 = vpop.permute.xlu0 %475  ;;  %v526_v22 = vpop.permute.xlu1 %525 }
 0x1bf   :  { %v620_v24 = vpop.permute.xlu0 %619 }
 0x1c0   :  { %v625_v25 = vsel %vm383_vm3, %v620_v24, 0 }
 0x270   :  { %v277_v27 = vpop.f32.mrf.mxu1 }
 0x271   :  { %v332_v28 = vmul.f32 0.35355338, %v277_v27  ;;  %v668_v27 = vpop.permute.xlu1 %667 }
 0x272   :  { %v2951_v29 = vpop.f32.mrf.mxu1 }
 0x273   :  { %v336_v30 = vsel %vm3726_vm4, %v332_v28, -1e+09  ;;  %v673_v28 = vsel %vm383_vm3, %v668_v27, 0 }
 0x274   :  { %v338_v31 = vsel %vm236_vm2, %v336_v30, -inf  ;;  %v280_v32 = vpop.f32.mrf.mxu1  ;;  %v326_v33 = vpop.f32.mrf.mxu0 }
 0x275   :  { %v339_v34 = vrot.slane %v338_v31, 4  ;;  %v333_v35 = vmul.f32 0.35355338, %v326_v33 }
 0x276   :  { %v2952_v36 = vpop.f32.mrf.mxu1  ;;  %v2957_v37 = vpop.f32.mrf.mxu0 }
 0x277   :  { %v340_v38 = vmax.f32 %v338_v31, %v339_v34  ;;  %v337_v39 = vsel %vm3726_vm4, %v333_v35, -1e+09 }
 0x278   :  { %v345_v40 = vsel %vm236_vm2, %v337_v39, -inf  ;;  %v329_v41 = vpop.f32.mrf.mxu0 }
 0x279   :  { %v341_v42 = vrot.slane %v340_v38, 2  ;;  %v346_v43 = vrot.slane %v345_v40, 4 }
 0x27a   :  { %v2958_v44 = vpop.f32.mrf.mxu0 }
 0x27b   :  { %v342_v45 = vmax.f32 %v340_v38, %v341_v42  ;;  %v347_v46 = vmax.f32 %v345_v40, %v346_v43 }
 0x27d   :  { %v343_v47 = vrot.slane %v342_v45, 1  ;;  %v348_v48 = vrot.slane %v347_v46, 2 }
 0x27f   :  { %v344_v49 = vmax.f32 %v342_v45, %v343_v47  ;;  %v349_v50 = vmax.f32 %v347_v46, %v348_v48 }
 0x281   :  { %v352_v51 = vsub.f32 %v336_v30, %v344_v49  ;;  %v350_v52 = vrot.slane %v349_v50, 1 }
 0x283   :  { %v354_v53 = vmul.f32 1.442695, %v352_v51  ;;  %v351_v54 = vmax.f32 %v349_v50, %v350_v52 }
 0x285   :  { %3259 = vpow2.f32 %v354_v53  ;;  %v353_v55 = vsub.f32 %v337_v39, %v351_v54 }
 0x287   :  { %v356_v56 = vmul.f32 1.442695, %v353_v55 }
 0x289   :  { %3261 = vpow2.f32 %v356_v56 }
 0x292   :  { %v3260_v57 = vpop.eup %3259 }
 0x293   :  { %v358_v58 = vsel %vm236_vm2, %v3260_v57, 0.0 }
 0x294   :  { %v359_v59 = vrot.slane %v358_v58, 4 }
 0x296   :  { %v3262_v60 = vpop.eup %3261  ;;  %v360_v61 = vadd.f32 %v359_v59, %v358_v58 }
 0x297   :  { %v365_v62 = vsel %vm236_vm2, %v3262_v60, 0.0 }
 0x298   :  { %v361_v63 = vrot.slane %v360_v61, 2  ;;  %v366_v1 = vrot.slane %v365_v62, 4 }
 0x29a   :  { %v362_v2 = vadd.f32 %v361_v63, %v360_v61  ;;  %v367_v5 = vadd.f32 %v366_v1, %v365_v62 }
 0x29c   :  { %v363_v6 = vrot.slane %v362_v2, 1  ;;  %v368_v7 = vrot.slane %v367_v5, 2 }
 0x29e   :  { %v364_v8 = vadd.f32 %v363_v6, %v362_v2  ;;  %v369_v9 = vadd.f32 %v368_v7, %v367_v5 }
 0x2a0   :  { %3263 = vrcp.f32 %v364_v8  ;;  %v370_v10 = vrot.slane %v369_v9, 1 }
 0x2a2   :  { %v371_v11 = vadd.f32 %v370_v10, %v369_v9 }
 0x2a4   :  { %3265 = vrcp.f32 %v371_v11 }
 0x2ad   :  { %v3264_v13 = vpop.eup %3263 }
 0x2ae   :  { %v374_v14 = vmul.f32 %v3264_v13, %v3260_v57 }
 0x2b0   :  { %v376_v16 = vpack.c.bf16 %v374_v14, %v374_v14 }
 0x2b1   :  { %v3266_v17 = vpop.eup %3265 }
 0x2b2   :  { %2962 = vmatmul.mubr.msk.bf16.vlgmr.msra.gmra.mxu1 %vm236_vm2, %v376_v16  ;;  %v375_v20 = vmul.f32 %v3266_v17, %v3262_v60 }
 0x2b3   :  { %2972 = vmatpush3.bf16.xpose.msra.mxu1 %v483_v19  ;;  %2973 = vmatprep.mubr.msk.bf16.mxu1 %vm3565_vm0, %v3564_v0 }
 0x2b4   :  { %v377_v21 = vpack.c.bf16 %v375_v20, %v375_v20  ;;  %2983 = vmatprep.subr.bf16.mxu1 %v3564_v0 }
 0x2b6   :  { %2968 = vmatmul.mubr.msk.bf16.vlgmr.msra.gmra.mxu0 %vm236_vm2, %v377_v21 }
 0x2b7   :  { %2978 = vmatpush3.bf16.xpose.msra.mxu0 %v533_v23  ;;  %2979 = vmatprep.mubr.msk.bf16.mxu0 %vm3565_vm0, %v3564_v0 }
 0x2b8   :  { %2989 = vmatprep.subr.bf16.mxu0 %v3564_v0 }
 0x2ba   :  { %2974 = vmatmul.mubr.msk.bf16.vlgmr.msra.gmra.mxu1 %vm236_vm2, %v476_v18 }
 0x2bb   :  { %2984 = vmatpush3.bf16.msra.mxu1 %v625_v25  ;;  %2985 = vmatprep.mubr.msk.bf16.mxu1 %vm3565_vm0, %v3564_v0  ;;  %v768_v25 = vpop.permute.xlu1 %767 }
 0x2bc   :  { %2995 = vmatprep.subr.bf16.mxu1 %v3564_v0 }
 0x2be   :  { %2980 = vmatmul.mubr.msk.bf16.vlgmr.msra.gmra.mxu0 %vm236_vm2, %v526_v22  ;;  %v718_v22 = vpop.permute.xlu0 %717 }
 0x2bf   :  { %2990 = vmatpush3.bf16.msra.mxu0 %v673_v28  ;;  %2991 = vmatprep.mubr.msk.bf16.mxu0 %vm3565_vm0, %v3564_v0 }
 0x2c0   :  { %3001 = vmatprep.subr.bf16.mxu0 %v3564_v0 }
 0x372   :  { %v3758_v29 = vpop.f32.mrf.mxu1 }
 0x374   :  { %v2963_v30 = vpop.f32.mrf.mxu1 }
 0x375   :  { %v716_v30 = vpop.permute.xlu0 %715 }
 0x376   :  { %v424_v31 = vpop.f32.mrf.mxu1  ;;  %v3760_v32 = vpop.f32.mrf.mxu0 }
 0x377   :  { %v723_v31 = vsel %vm236_vm2, %v718_v22, 0 }
 0x378   :  { %v2964_v33 = vpop.f32.mrf.mxu1  ;;  %v2969_v34 = vpop.f32.mrf.mxu0 }
 0x37a   :  { %v472_v35 = vpop.f32.mrf.mxu0  ;;  %v519_v36 = vpop.f32.mrf.mxu1 }
 0x37b   :  { %v575_v37 = vmul.f32 0.35355338, %v519_v36  ;;  %v766_v35 = vpop.permute.xlu1 %765  ;;  %v773_v36 = vsel %vm236_vm2, %v768_v25, 0 }
 0x37c   :  { %v2970_v38 = vpop.f32.mrf.mxu0  ;;  %v2975_v39 = vpop.f32.mrf.mxu1 }
 0x37d   :  { %v577_v40 = vsel %vm3726_vm4, %v575_v37, -1e+09  ;;  %v860_v37 = vpop.permute.xlu0 %859 }
 0x37e   :  { %v579_v41 = vsel %vm236_vm2, %v577_v40, -inf  ;;  %v522_v42 = vpop.f32.mrf.mxu1  ;;  %v569_v43 = vpop.f32.mrf.mxu0  ;;  %v865_v38 = vsel %vm383_vm3, %v860_v37, 0 }
 0x37f   :  { %v580_v44 = vrot.slane %v579_v41, 4  ;;  %v576_v45 = vmul.f32 0.35355338, %v569_v43  ;;  %v908_v39 = vpop.permute.xlu1 %907 }
 0x380   :  { %v2976_v46 = vpop.f32.mrf.mxu1  ;;  %v2981_v47 = vpop.f32.mrf.mxu0 }
 0x381   :  { %v581_v48 = vmax.f32 %v579_v41, %v580_v44  ;;  %v578_v49 = vsel %vm3726_vm4, %v576_v45, -1e+09 }
 0x382   :  { %v586_v50 = vsel %vm236_vm2, %v578_v49, -inf  ;;  %v572_v51 = vpop.f32.mrf.mxu0 }
 0x383   :  { %v582_v52 = vrot.slane %v581_v48, 2  ;;  %v587_v53 = vrot.slane %v586_v50, 4 }
 0x384   :  { %v2982_v54 = vpop.f32.mrf.mxu0 }
 0x385   :  { %v583_v55 = vmax.f32 %v581_v48, %v582_v52  ;;  %v588_v56 = vmax.f32 %v586_v50, %v587_v53 }
 0x387   :  { %v584_v57 = vrot.slane %v583_v55, 1  ;;  %v589_v58 = vrot.slane %v588_v56, 2 }
 0x389   :  { %v585_v59 = vmax.f32 %v583_v55, %v584_v57  ;;  %v590_v60 = vmax.f32 %v588_v56, %v589_v58 }
 0x38b   :  { %v593_v61 = vsub.f32 %v577_v40, %v585_v59  ;;  %v591_v62 = vrot.slane %v590_v60, 1  ;;  %v913_v40 = vsel %vm383_vm3, %v908_v39, 0 }
 0x38d   :  { %v595_v63 = vmul.f32 1.442695, %v593_v61  ;;  %v592_v1 = vmax.f32 %v590_v60, %v591_v62 }
 0x38f   :  { %3267 = vpow2.f32 %v595_v63  ;;  %v594_v2 = vsub.f32 %v578_v49, %v592_v1 }
 0x391   :  { %v597_v5 = vmul.f32 1.442695, %v594_v2 }
 0x393   :  { %3269 = vpow2.f32 %v597_v5 }
 0x39c   :  { %v3268_v6 = vpop.eup %3267 }
 0x39d   :  { %v599_v7 = vsel %vm236_vm2, %v3268_v6, 0.0 }
 0x39e   :  { %v600_v8 = vrot.slane %v599_v7, 4 }
 0x3a0   :  { %v3270_v9 = vpop.eup %3269  ;;  %v601_v10 = vadd.f32 %v600_v8, %v599_v7 }
 0x3a1   :  { %v606_v11 = vsel %vm236_vm2, %v3270_v9, 0.0 }
 0x3a2   :  { %v602_v12 = vrot.slane %v601_v10, 2  ;;  %v607_v13 = vrot.slane %v606_v11, 4 }
 0x3a4   :  { %v603_v14 = vadd.f32 %v602_v12, %v601_v10  ;;  %v608_v15 = vadd.f32 %v607_v13, %v606_v11 }
 0x3a6   :  { %v604_v16 = vrot.slane %v603_v14, 1  ;;  %v609_v17 = vrot.slane %v608_v15, 2 }
 0x3a8   :  { %v605_v18 = vadd.f32 %v604_v16, %v603_v14  ;;  %v610_v19 = vadd.f32 %v609_v17, %v608_v15 }
 0x3aa   :  { %3271 = vrcp.f32 %v605_v18  ;;  %v611_v20 = vrot.slane %v610_v19, 1 }
 0x3ac   :  { %v612_v21 = vadd.f32 %v611_v20, %v610_v19 }
 0x3ae   :  { %3273 = vrcp.f32 %v612_v21 }
 0x3b7   :  { %v3272_v23 = vpop.eup %3271 }
 0x3b8   :  { %v615_v24 = vmul.f32 %v3272_v23, %v3268_v6 }
 0x3ba   :  { %v617_v27 = vpack.c.bf16 %v615_v24, %v615_v24 }
 0x3bb   :  { %v3274_v28 = vpop.eup %3273 }
 0x3bc   :  { %2986 = vmatmul.mubr.msk.bf16.vlgmr.msra.gmra.mxu1 %vm236_vm2, %v617_v27  ;;  %v616_v33 = vmul.f32 %v3274_v28, %v3270_v9 }
 0x3bd   :  { %2996 = vmatpush3.bf16.xpose.msra.mxu1 %v723_v31  ;;  %2997 = vmatprep.mubr.msk.bf16.mxu1 %vm3565_vm0, %v3564_v0 }
 0x3be   :  { %v618_v34 = vpack.c.bf16 %v616_v33, %v616_v33  ;;  %3007 = vmatprep.subr.bf16.mxu1 %v3564_v0 }
 0x3c0   :  { %2992 = vmatmul.mubr.msk.bf16.vlgmr.msra.gmra.mxu0 %vm236_vm2, %v618_v34 }
 0x3c1   :  { %3002 = vmatpush3.bf16.xpose.msra.mxu0 %v773_v36  ;;  %3003 = vmatprep.mubr.msk.bf16.mxu0 %vm3565_vm0, %v3564_v0 }
 0x3c2   :  { %3013 = vmatprep.subr.bf16.mxu0 %v3564_v0 }
 0x3c4   :  { %2998 = vmatmul.mubr.msk.bf16.vlgmr.msra.gmra.mxu1 %vm236_vm2, %v716_v30 }
 0x3c5   :  { %3008 = vmatpush3.bf16.msra.mxu1 %v865_v38  ;;  %3009 = vmatprep.mubr.msk.bf16.mxu1 %vm3565_vm0, %v3564_v0  ;;  %v958_v38 = vpop.permute.xlu0 %957 }
 0x3c6   :  { %3019 = vmatprep.subr.bf16.mxu1 %v3564_v0 }
 0x3c8   :  { %3004 = vmatmul.mubr.msk.bf16.vlgmr.msra.gmra.mxu0 %vm236_vm2, %v766_v35 }
 0x3c9   :  { %3014 = vmatpush3.bf16.msra.mxu0 %v913_v40  ;;  %3015 = vmatprep.mubr.msk.bf16.mxu0 %vm3565_vm0, %v3564_v0 }
 0x3ca   :  { %3025 = vmatprep.subr.bf16.mxu0 %v3564_v0 }
 0x47c   :  { %v661_v41 = vpop.f32.mrf.mxu1 }
 0x47e   :  { %v2987_v42 = vpop.f32.mrf.mxu1 }
 0x480   :  { %v664_v43 = vpop.f32.mrf.mxu1  ;;  %v709_v44 = vpop.f32.mrf.mxu0 }
 0x481   :  { %v3215_v45 = vpack.i.bf16 %v709_v44, %v661_v41  ;;  %v1008_v41 = vpop.permute.xlu1 %1007  ;;  %v956_v44 = vpop.permute.xlu0 %955 }
 0x482   :  { %v2988_v46 = vpop.f32.mrf.mxu1  ;;  %v2993_v47 = vpop.f32.mrf.mxu0 }
 0x483   :  { %3216 = vrot.lane.b32.xlu0 %v3215_v45, %s3554_s19  ;;  %v963_v45 = vsel %vm236_vm2, %v958_v38, 0 }
 0x484   :  { %v712_v48 = vpop.f32.mrf.mxu0  ;;  %v759_v49 = vpop.f32.mrf.mxu1 }
 0x485   :  { %v815_v50 = vmul.f32 0.35355338, %v759_v49  ;;  %v1006_v48 = vpop.permute.xlu1 %1005  ;;  %v1013_v49 = vsel %vm236_vm2, %v1008_v41, 0 }
 0x486   :  { %v2994_v51 = vpop.f32.mrf.mxu0  ;;  %v2999_v52 = vpop.f32.mrf.mxu1 }
 0x487   :  { %v817_v53 = vsel %vm3726_vm4, %v815_v50, -1e+09  ;;  %v1100_v50 = vpop.permute.xlu0 %1099 }
 0x488   :  { %v819_v54 = vsel %vm236_vm2, %v817_v53, -inf  ;;  %v762_v55 = vpop.f32.mrf.mxu1  ;;  %v809_v56 = vpop.f32.mrf.mxu0  ;;  %v1105_v51 = vsel %vm383_vm3, %v1100_v50, 0 }
 0x489   :  { %v820_v57 = vrot.slane %v819_v54, 4  ;;  %v816_v58 = vmul.f32 0.35355338, %v809_v56  ;;  %v1148_v52 = vpop.permute.xlu1 %1147 }
 0x48a   :  { %v3000_v59 = vpop.f32.mrf.mxu1  ;;  %v3005_v60 = vpop.f32.mrf.mxu0 }
 0x48b   :  { %v821_v61 = vmax.f32 %v819_v54, %v820_v57  ;;  %v818_v62 = vsel %vm3726_vm4, %v816_v58, -1e+09 }
 0x48c   :  { %v826_v63 = vsel %vm236_vm2, %v818_v62, -inf  ;;  %v812_v1 = vpop.f32.mrf.mxu0 }
 0x48d   :  { %v822_v2 = vrot.slane %v821_v61, 2  ;;  %v827_v5 = vrot.slane %v826_v63, 4 }
 0x48e   :  { %v3006_v6 = vpop.f32.mrf.mxu0 }
 0x48f   :  { %v823_v7 = vmax.f32 %v821_v61, %v822_v2  ;;  %v828_v8 = vmax.f32 %v826_v63, %v827_v5 }
 0x491   :  { %v824_v9 = vrot.slane %v823_v7, 1  ;;  %v829_v10 = vrot.slane %v828_v8, 2 }
 0x493   :  { %v825_v11 = vmax.f32 %v823_v7, %v824_v9  ;;  %v830_v12 = vmax.f32 %v828_v8, %v829_v10 }
 0x495   :  { %v833_v13 = vsub.f32 %v817_v53, %v825_v11  ;;  %v831_v14 = vrot.slane %v830_v12, 1  ;;  %v1153_v53 = vsel %vm383_vm3, %v1148_v52, 0 }
 0x497   :  { %v835_v15 = vmul.f32 1.442695, %v833_v13  ;;  %v832_v16 = vmax.f32 %v830_v12, %v831_v14 }
 0x499   :  { %3275 = vpow2.f32 %v835_v15  ;;  %v834_v17 = vsub.f32 %v818_v62, %v832_v16 }
 0x49b   :  { %v837_v18 = vmul.f32 1.442695, %v834_v17 }
 0x49d   :  { %3277 = vpow2.f32 %v837_v18 }
 0x4a6   :  { %v3276_v19 = vpop.eup %3275 }
 0x4a7   :  { %v839_v20 = vsel %vm236_vm2, %v3276_v19, 0.0 }
 0x4a8   :  { %v840_v21 = vrot.slane %v839_v20, 4 }
 0x4aa   :  { %v3278_v22 = vpop.eup %3277  ;;  %v841_v23 = vadd.f32 %v840_v21, %v839_v20 }
 0x4ab   :  { %v846_v24 = vsel %vm236_vm2, %v3278_v22, 0.0 }
 0x4ac   :  { %v842_v25 = vrot.slane %v841_v23, 2  ;;  %v847_v27 = vrot.slane %v846_v24, 4 }
 0x4ae   :  { %v843_v28 = vadd.f32 %v842_v25, %v841_v23  ;;  %v848_v30 = vadd.f32 %v847_v27, %v846_v24 }
 0x4b0   :  { %v844_v31 = vrot.slane %v843_v28, 1  ;;  %v849_v33 = vrot.slane %v848_v30, 2 }
 0x4b2   :  { %v845_v34 = vadd.f32 %v844_v31, %v843_v28  ;;  %v850_v35 = vadd.f32 %v849_v33, %v848_v30 }
 0x4b4   :  { %3279 = vrcp.f32 %v845_v34  ;;  %v851_v36 = vrot.slane %v850_v35, 1 }
 0x4b6   :  { %v852_v37 = vadd.f32 %v851_v36, %v850_v35 }
 0x4b8   :  { %3281 = vrcp.f32 %v852_v37 }
 0x4c1   :  { %v3280_v39 = vpop.eup %3279 }
 0x4c2   :  { %v855_v40 = vmul.f32 %v3280_v39, %v3276_v19 }
 0x4c4   :  { %v857_v42 = vpack.c.bf16 %v855_v40, %v855_v40 }
 0x4c5   :  { %v3282_v43 = vpop.eup %3281 }
 0x4c6   :  { %3010 = vmatmul.mubr.msk.bf16.vlgmr.msra.gmra.mxu1 %vm236_vm2, %v857_v42  ;;  %v856_v46 = vmul.f32 %v3282_v43, %v3278_v22 }
 0x4c7   :  { %3020 = vmatpush3.bf16.xpose.msra.mxu1 %v963_v45  ;;  %3021 = vmatprep.mubr.msk.bf16.mxu1 %vm3565_vm0, %v3564_v0 }
 0x4c8   :  { %v858_v47 = vpack.c.bf16 %v856_v46, %v856_v46  ;;  %3031 = vmatprep.subr.bf16.mxu1 %v3564_v0 }
 0x4ca   :  { %3016 = vmatmul.mubr.msk.bf16.vlgmr.msra.gmra.mxu0 %vm236_vm2, %v858_v47 }
 0x4cb   :  { %3026 = vmatpush3.bf16.xpose.msra.mxu0 %v1013_v49  ;;  %3027 = vmatprep.mubr.msk.bf16.mxu0 %vm3565_vm0, %v3564_v0 }
 0x4cc   :  { %3037 = vmatprep.subr.bf16.mxu0 %v3564_v0 }
 0x4ce   :  { %3022 = vmatmul.mubr.msk.bf16.vlgmr.msra.gmra.mxu1 %vm236_vm2, %v956_v44 }
 0x4cf   :  { %3032 = vmatpush3.bf16.msra.mxu1 %v1105_v51  ;;  %3033 = vmatprep.mubr.msk.bf16.mxu1 %vm3565_vm0, %v3564_v0 }
 0x4d0   :  { %3043 = vmatprep.subr.bf16.mxu1 %v3564_v0 }
 0x4d2   :  { %3028 = vmatmul.mubr.msk.bf16.vlgmr.msra.gmra.mxu0 %vm236_vm2, %v1006_v48 }
 0x4d3   :  { %3038 = vmatpush3.bf16.msra.mxu0 %v1153_v53  ;;  %3039 = vmatprep.mubr.msk.bf16.mxu0 %vm3565_vm0, %v3564_v0 }
 0x4d4   :  { %3051 = vmatprep.subr.bf16.mxu0 %v3564_v0 }
 0x586   :  { %v901_v54 = vpop.f32.mrf.mxu1 }
 0x588   :  { %v3011_v55 = vpop.f32.mrf.mxu1 }
 0x58a   :  { %v904_v56 = vpop.f32.mrf.mxu1  ;;  %v949_v57 = vpop.f32.mrf.mxu0 }
 0x58b   :  { %v3220_v58 = vpack.i.bf16 %v949_v57, %v901_v54  ;;  %v3247_v57 = vld [vmem:[#allocation16 + $0x8] sm:$0xff]  }
 0x58c   :  { %v3012_v59 = vpop.f32.mrf.mxu1  ;;  %v3017_v60 = vpop.f32.mrf.mxu0 }
 0x58d   :  { %3221 = vrot.lane.b32.xlu1 %v3220_v58, %s3576_s26  ;;  %v3248_v58 = vld [vmem:[#allocation16] sm:$0xff]  }
 0x58e   :  { %v952_v61 = vpop.f32.mrf.mxu0  ;;  %v999_v62 = vpop.f32.mrf.mxu1 }
 0x58f   :  { %v1055_v63 = vmul.f32 0.35355338, %v999_v62 }
 0x590   :  { %v3018_v1 = vpop.f32.mrf.mxu0  ;;  %v3023_v2 = vpop.f32.mrf.mxu1 }
 0x591   :  { %v1057_v5 = vsel %vm3726_vm4, %v1055_v63, -1e+09 }
 0x592   :  { %v1059_v6 = vsel %vm236_vm2, %v1057_v5, -inf  ;;  %v1002_v7 = vpop.f32.mrf.mxu1  ;;  %v1049_v8 = vpop.f32.mrf.mxu0 }
 0x593   :  { %v1060_v9 = vrot.slane %v1059_v6, 4  ;;  %v1056_v10 = vmul.f32 0.35355338, %v1049_v8  ;;  %v3217_v7 = vpop.permute.xlu0 %3216 }
 0x594   :  { %v3024_v11 = vpop.f32.mrf.mxu1  ;;  %v3029_v12 = vpop.f32.mrf.mxu0 }
 0x595   :  { %v1061_v13 = vmax.f32 %v1059_v6, %v1060_v9  ;;  %v1058_v14 = vsel %vm3726_vm4, %v1056_v10, -1e+09  ;;  %v3219_v9 = vunpack.i.h.bf16 %v3217_v7  ;;  %v3218_v10 = vunpack.i.l.bf16 %v3217_v7 }
 0x596   :  { %v1066_v15 = vsel %vm236_vm2, %v1058_v14, -inf  ;;  %v1052_v16 = vpop.f32.mrf.mxu0 }
 0x597   :  { %v1062_v17 = vrot.slane %v1061_v13, 2  ;;  %v1067_v18 = vrot.slane %v1066_v15, 4 }
 0x598   :  { %v3030_v19 = vpop.f32.mrf.mxu0 }
 0x599   :  { %v1063_v20 = vmax.f32 %v1061_v13, %v1062_v17  ;;  %v1068_v21 = vmax.f32 %v1066_v15, %v1067_v18  ;;  %v1219_v15 = vsel %vm236_vm2, %v3758_v29, %v3218_v10  ;;  %v2808_v29 = vld [vmem:[%s4083_s9] ss:$0 sm:$0xff]  ;;  %v2814_v10 = vld [vmem:[#allocation11] ss:$0 sm:$0xff] }
 0x59b   :  { %v1064_v22 = vrot.slane %v1063_v20, 1  ;;  %v1069_v23 = vrot.slane %v1068_v21, 2 }
 0x59d   :  { %v1065_v24 = vmax.f32 %v1063_v20, %v1064_v22  ;;  %v1070_v25 = vmax.f32 %v1068_v21, %v1069_v23 }
 0x59f   :  { %v1073_v27 = vsub.f32 %v1057_v5, %v1065_v24  ;;  %v1071_v28 = vrot.slane %v1070_v25, 1 }
 0x5a1   :  { %v1075_v30 = vmul.f32 1.442695, %v1073_v27  ;;  %v1072_v31 = vmax.f32 %v1070_v25, %v1071_v28 }
 0x5a3   :  { %3283 = vpow2.f32 %v1075_v30  ;;  %v1074_v33 = vsub.f32 %v1058_v14, %v1072_v31  ;;  %v1220_v14 = vsel %vm236_vm2, %v3760_v32, %v3219_v9 }
 0x5a5   :  { %v1077_v34 = vmul.f32 1.442695, %v1074_v33 }
 0x5a7   :  { %3285 = vpow2.f32 %v1077_v34 }
 0x5b0   :  { %v3284_v35 = vpop.eup %3283 }
 0x5b1   :  { %v1079_v36 = vsel %vm236_vm2, %v3284_v35, 0.0 }
 0x5b2   :  { %v1080_v37 = vrot.slane %v1079_v36, 4 }
 0x5b4   :  { %v3286_v38 = vpop.eup %3285  ;;  %v1081_v39 = vadd.f32 %v1080_v37, %v1079_v36 }
 0x5b5   :  { %v1086_v40 = vsel %vm236_vm2, %v3286_v38, 0.0 }
 0x5b6   :  { %v1082_v41 = vrot.slane %v1081_v39, 2  ;;  %v1087_v42 = vrot.slane %v1086_v40, 4 }
 0x5b8   :  { %v1083_v43 = vadd.f32 %v1082_v41, %v1081_v39  ;;  %v1088_v44 = vadd.f32 %v1087_v42, %v1086_v40 }
 0x5ba   :  { %v1084_v45 = vrot.slane %v1083_v43, 1  ;;  %v1089_v46 = vrot.slane %v1088_v44, 2 }
 0x5bc   :  { %v1085_v47 = vadd.f32 %v1084_v45, %v1083_v43  ;;  %v1090_v48 = vadd.f32 %v1089_v46, %v1088_v44  ;;  %v3249_v44 = vld [vmem:[#allocation10 + $0x8] sm:$0xff]   ;;  %v3250_v45 = vld [vmem:[#allocation13 + $0x8] sm:$0xff]   ;;  %v3252_v46 = vld [vmem:[#allocation13] sm:$0xff]  }
 0x5be   :  { %3287 = vrcp.f32 %v1085_v47  ;;  %v1091_v49 = vrot.slane %v1090_v48, 1  ;;  %v3860_v47 = vld [vmem:[#allocation5] sm:$0xff] }
 0x5c0   :  { %v1092_v50 = vadd.f32 %v1091_v49, %v1090_v48  ;;  %v3862_v48 = vld [vmem:[#allocation5 + $0x8] sm:$0xff] }
 0x5c1   :  { %v1404_v49 = vpack.c.bf16 %v3862_v48, %v3860_v47 }
 0x5c2   :  { %3289 = vrcp.f32 %v1092_v50 }
 0x5cb   :  { %v3288_v51 = vpop.eup %3287 }
 0x5cc   :  { %v1095_v52 = vmul.f32 %v3288_v51, %v3284_v35 }
 0x5ce   :  { %v1097_v53 = vpack.c.bf16 %v1095_v52, %v1095_v52 }
 0x5cf   :  { %v3290_v54 = vpop.eup %3289 }
 0x5d0   :  { %3034 = vmatmul.mubr.msk.bf16.vlgmr.msra.gmra.mxu1 %vm236_vm2, %v1097_v53  ;;  %v1096_v55 = vmul.f32 %v3290_v54, %v3286_v38 }
 0x5d1   :  { %3047 = vmatprep.mubr.msk.bf16.mxu1 %vm3565_vm0, %v3564_v0  ;;  %3044 = vmatpush3.bf16.msra.mxu1 %v3247_v57 }
 0x5d2   :  { %v1098_v56 = vpack.c.bf16 %v1096_v55, %v1096_v55  ;;  %3045 = vmatprep.subr.bf16.mxu1 %v3564_v0 }
 0x5d4   :  { %3040 = vmatmul.mubr.msk.bf16.vlgmr.msra.gmra.mxu0 %vm236_vm2, %v1098_v56 }
 0x5d5   :  { %3055 = vmatprep.mubr.msk.bf16.mxu0 %vm3565_vm0, %v3564_v0  ;;  %3046 = vmatpush3.bf16.msra.mxu1 %v3248_v58  ;;  %v2812_v58 = vld [vmem:[%s4083_s9 + $0x4] ss:$0 sm:$0xff] }
 0x5d6   :  { %3059 = vmatprep.subr.bf16.mxu1 %v3564_v0  ;;  %3052 = vmatpush3.bf16.msra.mxu0 %v3249_v44 }
 0x5d7   :  { %3053 = vmatprep.subr.bf16.mxu0 %v3564_v0 }
 0x5ff   :  { %v3222_v8 = vpop.permute.xlu1 %3221 }
 0x600   :  { %v3224_v11 = vunpack.i.h.bf16 %v3222_v8  ;;  %v3223_v12 = vunpack.i.l.bf16 %v3222_v8 }
 0x602   :  { %v1223_v18 = vsel %vm1221_vm5, %v1220_v14, %v3224_v11  ;;  %v1222_v19 = vsel %vm1221_vm5, %v1219_v15, %v3223_v12  ;;  %v2818_v14 = vld [vmem:[#allocation14] ss:$0 sm:$0xff] }
 0x690   :  { %v1141_v59 = vpop.f32.mrf.mxu1 }
 0x692   :  { %v3035_v60 = vpop.f32.mrf.mxu1 }
 0x694   :  { %v1144_v61 = vpop.f32.mrf.mxu1  ;;  %v1189_v62 = vpop.f32.mrf.mxu0 }
 0x695   :  { %v3225_v63 = vpack.i.bf16 %v1189_v62, %v1141_v59  ;;  %v2813_v62 = vld [vmem:[%s4083_s9 + $0x5] ss:$0 sm:$0xff] }
 0x696   :  { %v3036_v1 = vpop.f32.mrf.mxu1  ;;  %v3041_v2 = vpop.f32.mrf.mxu0 }
 0x697   :  { %3226 = vrot.lane.b32.xlu0 %v3225_v63, %s3577_s27 }
 0x698   :  { %v1192_v5 = vpop.f32.mrf.mxu0 }
 0x69a   :  { %v3042_v6 = vpop.f32.mrf.mxu0 }
 0x709   :  { %v3227_v13 = vpop.permute.xlu0 %3226 }
 0x70a   :  { %v3229_v16 = vunpack.i.h.bf16 %v3227_v13  ;;  %v3228_v17 = vunpack.i.l.bf16 %v3227_v13 }
 0x70c   :  { %v1226_v20 = vsel %vm1224_vm6, %v1223_v18, %v3229_v16  ;;  %v1225_v21 = vsel %vm1224_vm6, %v1222_v19, %v3228_v17 }
 0x70d   :  { %v1227_v22 = vpack.c.bf16 %v1226_v20, %v1225_v21 }
 0x70f   :  { %3048 = vmatmul.mubr.msk.bf16.vlgmr.msra.gmra.mxu1 %vm186_vm1, %v1227_v22 }
 0x710   :  { %3063 = vmatprep.mubr.msk.bf16.mxu1 %vm3565_vm0, %v3564_v0  ;;  %3060 = vmatpush3.bf16.msra.mxu1 %v3250_v45 }
 0x711   :  { %3061 = vmatprep.subr.bf16.mxu1 %v3564_v0 }
 0x714   :  { %3062 = vmatpush3.bf16.msra.mxu1 %v3252_v46 }
 0x715   :  { %3073 = vmatprep.subr.bf16.mxu1 %v3564_v0 }
 0x717   :  { %3064 = vmatmul.mubr.msk.bf16.vlgmr.msra.gmra.mxu1 %vm186_vm1, %v1404_v49 }
 0x718   :  { %3075 = vmatprep.mubr.msk.bf16.mxu1 %vm3565_vm0, %v3564_v0 }
 0x7cf   :  { %v1286_v32 = vpop.f32.mrf.mxu1 }
 0x7d0   :  { %v1287_v23 = vadd.f32 %v2808_v29, %v1286_v32 }
 0x7d1   :  { %v3049_v24 = vpop.f32.mrf.mxu1 }
 0x7d2   :  { %v1293_v25 = vadd.f32 %v1287_v23, %v3685_v3 }
 0x7d3   :  { %v1289_v27 = vpop.f32.mrf.mxu1 }
 0x7d4   :  { %v1290_v28 = vadd.f32 %v2808_v29, %v1289_v27  ;;  %v1295_v30 = vsel %vm186_vm1, %v1293_v25, 0.0 }
 0x7d5   :  { %1296 = vadd.xlane.f32.xlu1 %v1295_v30  ;;  %v3050_v31 = vpop.f32.mrf.mxu1 }
 0x7d6   :  { %v1294_v33 = vadd.f32 %v1290_v28, %v3687_v4  ;;  %v3251_v4 = vld [vmem:[#allocation10] sm:$0xff]  }
 0x7d7   :  { %3054 = vmatpush3.bf16.msra.mxu0 %v3251_v4  ;;  %v1465_v6 = vpop.f32.mrf.mxu1 }
 0x7d8   :  { %v1298_v34 = vsel %vm186_vm1, %v1294_v33, 0.0  ;;  %3067 = vmatprep.subr.bf16.mxu0 %v3564_v0  ;;  %v1466_v17 = vadd.f32 %v2818_v14, %v1465_v6 }
 0x7d9   :  { %1299 = vadd.xlane.f32.xlu0 %v1298_v34  ;;  %v3065_v7 = vpop.f32.mrf.mxu1 }
 0x7da   :  { %v1472_v29 = vpack.c.bf16 %v1466_v17, %v1466_v17 }
 0x7db   :  { %v1468_v8 = vpop.f32.mrf.mxu1 }
 0x7dc   :  { %v1469_v20 = vadd.f32 %v2818_v14, %v1468_v8 }
 0x7dd   :  { %v3066_v9 = vpop.f32.mrf.mxu1 }
 0x7de   :  { %v1473_v32 = vpack.c.bf16 %v1469_v20, %v1469_v20 }
 0x85e   :  { %v1297_v35 = vpop.xlane.xlu1 %1296 }
 0x85f   :  { %v1302_v36 = vmul.f32 0.03125, %v1297_v35 }
 0x861   :  { %v1304_v37 = vsub.f32 %v1293_v25, %v1302_v36 }
 0x862   :  { %v1300_v38 = vpop.xlane.xlu0 %1299 }
 0x863   :  { %v1303_v39 = vmul.f32 0.03125, %v1300_v38  ;;  %v1306_v40 = vmul.f32 %v1304_v37, %v1304_v37 }
 0x865   :  { %v1305_v41 = vsub.f32 %v1294_v33, %v1303_v39  ;;  %v1308_v3 = vsel %vm186_vm1, %v1306_v40, 0.0 }
 0x866   :  { %1309 = vadd.xlane.f32.xlu0 %v1308_v3 }
 0x867   :  { %v1307_v42 = vmul.f32 %v1305_v41, %v1305_v41 }
 0x869   :  { %v1311_v43 = vsel %vm186_vm1, %v1307_v42, 0.0 }
 0x86a   :  { %1312 = vadd.xlane.f32.xlu1 %v1311_v43 }
 0x8ef   :  { %v1310_v50 = vpop.xlane.xlu0 %1309 }
 0x8f0   :  { %v1314_v51 = vmul.f32 0.03125, %v1310_v50 }
 0x8f2   :  { %v1316_v52 = vadd.f32 1e-05, %v1314_v51 }
 0x8f3   :  { %v1313_v53 = vpop.xlane.xlu1 %1312 }
 0x8f4   :  { %3291 = vrsqrt.f32 %v1316_v52  ;;  %v1315_v54 = vmul.f32 0.03125, %v1313_v53 }
 0x8f6   :  { %v1317_v55 = vadd.f32 1e-05, %v1315_v54 }
 0x8f8   :  { %3293 = vrsqrt.f32 %v1317_v55 }
 0x901   :  { %v3292_v56 = vpop.eup %3291 }
 0x902   :  { %v1320_v57 = vmul.f32 %v3292_v56, %v1304_v37 }
 0x904   :  { %v1327_v61 = vmul.f32 %v2812_v58, %v1320_v57 }
 0x905   :  { %v3294_v59 = vpop.eup %3293 }
 0x906   :  { %v1321_v60 = vmul.f32 %v3294_v59, %v1305_v41  ;;  %v1334_v1 = vadd.f32 %v2813_v62, %v1327_v61 }
 0x908   :  { %v1328_v63 = vmul.f32 %v2812_v58, %v1321_v60 }
 0x90a   :  { %v1335_v2 = vadd.f32 %v2813_v62, %v1328_v63 }
 0x90c   :  { %v1336_v5 = vpack.c.bf16 %v1335_v2, %v1334_v1 }
 0x90e   :  { %3056 = vmatmul.mubr.msk.bf16.vlgmr.msra.gmra.mxu0 %vm186_vm1, %v1336_v5 }
 0x90f   :  { %3069 = vmatprep.mubr.msk.bf16.mxu0 %vm3565_vm0, %v3564_v0 }
 0x9ce   :  { %v1397_v11 = vpop.f32.mrf.mxu0 }
 0x9cf   :  { %v1398_v12 = vadd.f32 %v2814_v10, %v1397_v11 }
 0x9d0   :  { %v3057_v13 = vpop.f32.mrf.mxu0 }
 0x9d1   :  { %v1474_v15 = vpack.c.bf16 %v1398_v12, %v1398_v12 }
 0x9d2   :  { %v1400_v16 = vpop.f32.mrf.mxu0 }
 0x9d3   :  { %v1401_v18 = vadd.f32 %v2814_v10, %v1400_v16  ;;  %1613 = vrot.lane.b32.xlu0 %v1474_v15, %s3566_s6  ;;  %v1480_v19 = vsel %vm236_vm2, %v1474_v15, 0 }
 0x9d4   :  { %v3058_v21 = vpop.f32.mrf.mxu0  ;;  %3068 = vmatpush3.bf16.xpose.msra.mxu0 %v1480_v19 }
 0x9d5   :  { %v1475_v22 = vpack.c.bf16 %v1401_v18, %v1401_v18  ;;  %3079 = vmatprep.subr.bf16.mxu0 %v3564_v0 }
 0x9d7   :  { %1764 = vrot.lane.b32.xlu0 %v1475_v22, %s3567_s8  ;;  %1662 = vrot.lane.b32.xlu1 %v1475_v22, %s3566_s6  ;;  %v1526_v23 = vsel %vm236_vm2, %v1475_v22, 0 }
 0x9d8   :  { %3074 = vmatpush3.bf16.xpose.msra.mxu1 %v1526_v23 }
 0x9d9   :  { %3085 = vmatprep.subr.bf16.mxu1 %v3564_v0 }
 0x9db   :  { %3070 = vmatmul.mubr.msk.bf16.vlgmr.msra.gmra.mxu0 %vm236_vm2, %v1472_v29  ;;  %1762 = vrot.lane.b32.xlu0 %v1473_v32, %s3567_s8 }
 0x9dc   :  { %1713 = vrot.lane.b32.xlu1 %v1474_v15, %s3567_s8  ;;  %3081 = vmatprep.mubr.msk.bf16.mxu0 %vm3565_vm0, %v3564_v0 }
 0x9df   :  { %1904 = vrot.lane.b32.xlu0 %v1475_v22, %s3568_s20  ;;  %3076 = vmatmul.mubr.msk.bf16.vlgmr.msra.gmra.mxu1 %vm236_vm2, %v1473_v32 }
 0x9e0   :  { %1711 = vrot.lane.b32.xlu1 %v1472_v29, %s3567_s8  ;;  %3087 = vmatprep.mubr.msk.bf16.mxu1 %vm3565_vm0, %v3564_v0 }
 0x9e3   :  { %2004 = vrot.lane.b32.xlu0 %v1475_v22, %s3570_s22 }
 0x9e4   :  { %1856 = vrot.lane.b32.xlu1 %v1474_v15, %s3568_s20 }
 0x9e7   :  { %2002 = vrot.lane.b32.xlu0 %v1473_v32, %s3570_s22 }
 0x9e8   :  { %1954 = vrot.lane.b32.xlu1 %v1474_v15, %s3570_s22 }
 0x9eb   :  { %2144 = vrot.lane.b32.xlu0 %v1475_v22, %s3571_s5 }
 0x9ec   :  { %1952 = vrot.lane.b32.xlu1 %v1472_v29, %s3570_s22 }
 0x9ef   :  { %2244 = vrot.lane.b32.xlu0 %v1475_v22, %s3573_s7 }
 0x9f0   :  { %2096 = vrot.lane.b32.xlu1 %v1474_v15, %s3571_s5  ;;  %s3578_s5 = smov [#allocation17]  }
 0x9f1   :  { %s2772_s23 = sshll.u32 %s3578_s5, 4  ;;  %s2773_s23 = int_to_ptr.vmem [resolvable:$true] %s2772_s23 }
 0x9f2   :  { %p3524_p4 = scmp.lt.s32.totalorder %s2773_s23, %s2773_s23 }
 0x9f3   :  { %2242 = vrot.lane.b32.xlu0 %v1473_v32, %s3573_s7 }
 0x9f4   :  { %2194 = vrot.lane.b32.xlu1 %v1474_v15, %s3573_s7 }
 0x9f7   :  { %2384 = vrot.lane.b32.xlu0 %v1475_v22, %s3574_s24 }
 0x9f8   :  { %2192 = vrot.lane.b32.xlu1 %v1472_v29, %s3573_s7  ;;  %s3519_s7 = scalar_lea.vmem %s2773_s23, 256 }
 0x9f9   :  { %p3520_p3 = scmp.ne.s32.totalorder %s2773_s23, %s3519_s7  ;;  %p3525_p5 = scmp.lt.s32.totalorder %s3519_s7, %s3519_s7 }
 0x9fb   :  { %p3526_p6 = por %p3525_p5, %p3524_p4 }
 0x9fc   :  { %2336 = vrot.lane.b32.xlu1 %v1474_v15, %s3574_s24 }
 0x9fd   :  { %p3527_p7 = pnand %p3526_p6, %p3520_p3 }
 0xa45   :  { %v1614_v24 = vpop.permute.xlu0 %1613 }
 0xa46   :  { %v1619_v25 = vsel %vm383_vm3, %v1614_v24, 0 }
 0xa47   :  { %3080 = vmatpush3.bf16.msra.mxu0 %v1619_v25 }
 0xa48   :  { %3091 = vmatprep.subr.bf16.mxu0 %v3564_v0 }
 0xa49   :  { %v1663_v27 = vpop.permute.xlu1 %1662  ;;  %v1765_v19 = vpop.permute.xlu0 %1764 }
 0xa4a   :  { %v1668_v28 = vsel %vm383_vm3, %v1663_v27, 0  ;;  %v1770_v25 = vsel %vm236_vm2, %v1765_v19, 0 }
 0xa4b   :  { %3086 = vmatpush3.bf16.msra.mxu1 %v1668_v28 }
 0xa4c   :  { %3097 = vmatprep.subr.bf16.mxu1 %v3564_v0 }
 0xa4d   :  { %v1763_v24 = vpop.permute.xlu0 %1762 }
 0xa4e   :  { %v1714_v16 = vpop.permute.xlu1 %1713 }
 0xa4f   :  { %v1719_v29 = vsel %vm236_vm2, %v1714_v16, 0 }
 0xa52   :  { %v1712_v22 = vpop.permute.xlu1 %1711 }
 0xa56   :  { %v1857_v27 = vpop.permute.xlu1 %1856 }
 0xa57   :  { %v1862_v28 = vsel %vm383_vm3, %v1857_v27, 0 }
 0xa9b   :  { %v1516_v30 = vpop.f32.mrf.mxu0 }
 0xa9c   :  { %v1568_v31 = vmul.f32 0.35355338, %v1516_v30  ;;  %v1905_v30 = vpop.permute.xlu0 %1904 }
 0xa9d   :  { %v3071_v33 = vpop.f32.mrf.mxu0 }
 0xa9e   :  { %v1570_v34 = vsel %vm3726_vm4, %v1568_v31, -1e+09  ;;  %v1910_v31 = vsel %vm383_vm3, %v1905_v30, 0 }
 0xa9f   :  { %v1572_v35 = vsel %vm236_vm2, %v1570_v34, -inf  ;;  %v1519_v36 = vpop.f32.mrf.mxu0  ;;  %v1562_v37 = vpop.f32.mrf.mxu1 }
 0xaa0   :  { %v1573_v38 = vrot.slane %v1572_v35, 4  ;;  %v1569_v39 = vmul.f32 0.35355338, %v1562_v37 }
 0xaa1   :  { %v3072_v40 = vpop.f32.mrf.mxu0  ;;  %v3077_v41 = vpop.f32.mrf.mxu1 }
 0xaa2   :  { %v1574_v3 = vmax.f32 %v1572_v35, %v1573_v38  ;;  %v1571_v42 = vsel %vm3726_vm4, %v1569_v39, -1e+09 }
 0xaa3   :  { %v1579_v43 = vsel %vm236_vm2, %v1571_v42, -inf  ;;  %v1565_v44 = vpop.f32.mrf.mxu1 }
 0xaa4   :  { %v1575_v45 = vrot.slane %v1574_v3, 2  ;;  %v1580_v4 = vrot.slane %v1579_v43, 4 }
 0xaa5   :  { %v3078_v46 = vpop.f32.mrf.mxu1 }
 0xaa6   :  { %v1576_v49 = vmax.f32 %v1574_v3, %v1575_v45  ;;  %v1581_v50 = vmax.f32 %v1579_v43, %v1580_v4 }
 0xaa8   :  { %v1577_v51 = vrot.slane %v1576_v49, 1  ;;  %v1582_v52 = vrot.slane %v1581_v50, 2 }
 0xaaa   :  { %v1578_v53 = vmax.f32 %v1576_v49, %v1577_v51  ;;  %v1583_v54 = vmax.f32 %v1581_v50, %v1582_v52 }
 0xaac   :  { %v1586_v55 = vsub.f32 %v1570_v34, %v1578_v53  ;;  %v1584_v56 = vrot.slane %v1583_v54, 1 }
 0xaae   :  { %v1588_v57 = vmul.f32 1.442695, %v1586_v55  ;;  %v1585_v58 = vmax.f32 %v1583_v54, %v1584_v56 }
 0xab0   :  { %3295 = vpow2.f32 %v1588_v57  ;;  %v1587_v59 = vsub.f32 %v1571_v42, %v1585_v58 }
 0xab2   :  { %v1590_v60 = vmul.f32 1.442695, %v1587_v59 }
 0xab4   :  { %3297 = vpow2.f32 %v1590_v60 }
 0xabd   :  { %v3296_v61 = vpop.eup %3295 }
 0xabe   :  { %v1592_v62 = vsel %vm236_vm2, %v3296_v61, 0.0 }
 0xabf   :  { %v1593_v63 = vrot.slane %v1592_v62, 4 }
 0xac1   :  { %v3298_v1 = vpop.eup %3297  ;;  %v1594_v2 = vadd.f32 %v1593_v63, %v1592_v62 }
 0xac2   :  { %v1599_v5 = vsel %vm236_vm2, %v3298_v1, 0.0 }
 0xac3   :  { %v1595_v6 = vrot.slane %v1594_v2, 2  ;;  %v1600_v7 = vrot.slane %v1599_v5, 4 }
 0xac5   :  { %v1596_v8 = vadd.f32 %v1595_v6, %v1594_v2  ;;  %v1601_v9 = vadd.f32 %v1600_v7, %v1599_v5 }
 0xac7   :  { %v1597_v10 = vrot.slane %v1596_v8, 1  ;;  %v1602_v11 = vrot.slane %v1601_v9, 2 }
 0xac9   :  { %v1598_v12 = vadd.f32 %v1597_v10, %v1596_v8  ;;  %v1603_v13 = vadd.f32 %v1602_v11, %v1601_v9 }
 0xacb   :  { %3299 = vrcp.f32 %v1598_v12  ;;  %v1604_v14 = vrot.slane %v1603_v13, 1 }
 0xacd   :  { %v1605_v15 = vadd.f32 %v1604_v14, %v1603_v13 }
 0xacf   :  { %3301 = vrcp.f32 %v1605_v15 }
 0xad8   :  { %v3300_v17 = vpop.eup %3299 }
 0xad9   :  { %v1608_v18 = vmul.f32 %v3300_v17, %v3296_v61 }
 0xadb   :  { %v1610_v20 = vpack.c.bf16 %v1608_v18, %v1608_v18 }
 0xadc   :  { %v3302_v21 = vpop.eup %3301 }
 0xadd   :  { %3082 = vmatmul.mubr.msk.bf16.vlgmr.msra.gmra.mxu0 %vm236_vm2, %v1610_v20  ;;  %v1609_v32 = vmul.f32 %v3302_v21, %v3298_v1 }
 0xade   :  { %3092 = vmatpush3.bf16.xpose.msra.mxu0 %v1719_v29  ;;  %3093 = vmatprep.mubr.msk.bf16.mxu0 %vm3565_vm0, %v3564_v0 }
 0xadf   :  { %v1611_v23 = vpack.c.bf16 %v1609_v32, %v1609_v32  ;;  %3103 = vmatprep.subr.bf16.mxu0 %v3564_v0 }
 0xae1   :  { %3088 = vmatmul.mubr.msk.bf16.vlgmr.msra.gmra.mxu1 %vm236_vm2, %v1611_v23 }
 0xae2   :  { %3098 = vmatpush3.bf16.xpose.msra.mxu1 %v1770_v25  ;;  %3099 = vmatprep.mubr.msk.bf16.mxu1 %vm3565_vm0, %v3564_v0 }
 0xae3   :  { %3109 = vmatprep.subr.bf16.mxu1 %v3564_v0 }
 0xae5   :  { %3094 = vmatmul.mubr.msk.bf16.vlgmr.msra.gmra.mxu0 %vm236_vm2, %v1712_v22 }
 0xae6   :  { %3104 = vmatpush3.bf16.msra.mxu0 %v1862_v28  ;;  %3105 = vmatprep.mubr.msk.bf16.mxu0 %vm3565_vm0, %v3564_v0  ;;  %v2005_v28 = vpop.permute.xlu0 %2004 }
 0xae7   :  { %3115 = vmatprep.subr.bf16.mxu0 %v3564_v0 }
 0xae9   :  { %3100 = vmatmul.mubr.msk.bf16.vlgmr.msra.gmra.mxu1 %vm236_vm2, %v1763_v24  ;;  %v1955_v24 = vpop.permute.xlu1 %1954 }
 0xaea   :  { %3110 = vmatpush3.bf16.msra.mxu1 %v1910_v31  ;;  %3111 = vmatprep.mubr.msk.bf16.mxu1 %vm3565_vm0, %v3564_v0 }
 0xaeb   :  { %3121 = vmatprep.subr.bf16.mxu1 %v3564_v0 }
 0xb9d   :  { %v3941_v33 = vpop.f32.mrf.mxu0 }
 0xb9f   :  { %v3083_v34 = vpop.f32.mrf.mxu0 }
 0xba0   :  { %v1953_v34 = vpop.permute.xlu1 %1952 }
 0xba1   :  { %v1658_v35 = vpop.f32.mrf.mxu0  ;;  %v3943_v36 = vpop.f32.mrf.mxu1 }
 0xba2   :  { %v1960_v35 = vsel %vm236_vm2, %v1955_v24, 0 }
 0xba3   :  { %v3084_v37 = vpop.f32.mrf.mxu0  ;;  %v3089_v38 = vpop.f32.mrf.mxu1 }
 0xba5   :  { %v1707_v39 = vpop.f32.mrf.mxu1  ;;  %v1755_v40 = vpop.f32.mrf.mxu0 }
 0xba6   :  { %v1812_v41 = vmul.f32 0.35355338, %v1755_v40  ;;  %v2003_v39 = vpop.permute.xlu0 %2002  ;;  %v2010_v40 = vsel %vm236_vm2, %v2005_v28, 0 }
 0xba7   :  { %v3090_v3 = vpop.f32.mrf.mxu1  ;;  %v3095_v42 = vpop.f32.mrf.mxu0 }
 0xba8   :  { %v1814_v43 = vsel %vm3726_vm4, %v1812_v41, -1e+09  ;;  %v2097_v41 = vpop.permute.xlu1 %2096 }
 0xba9   :  { %v1816_v44 = vsel %vm236_vm2, %v1814_v43, -inf  ;;  %v1758_v45 = vpop.f32.mrf.mxu0  ;;  %v1806_v4 = vpop.f32.mrf.mxu1  ;;  %v2102_v3 = vsel %vm383_vm3, %v2097_v41, 0 }
 0xbaa   :  { %v1817_v46 = vrot.slane %v1816_v44, 4  ;;  %v1813_v49 = vmul.f32 0.35355338, %v1806_v4  ;;  %v2145_v42 = vpop.permute.xlu0 %2144 }
 0xbab   :  { %v3096_v50 = vpop.f32.mrf.mxu0  ;;  %v3101_v51 = vpop.f32.mrf.mxu1 }
 0xbac   :  { %v1818_v52 = vmax.f32 %v1816_v44, %v1817_v46  ;;  %v1815_v53 = vsel %vm3726_vm4, %v1813_v49, -1e+09 }
 0xbad   :  { %v1823_v54 = vsel %vm236_vm2, %v1815_v53, -inf  ;;  %v1809_v55 = vpop.f32.mrf.mxu1 }
 0xbae   :  { %v1819_v56 = vrot.slane %v1818_v52, 2  ;;  %v1824_v57 = vrot.slane %v1823_v54, 4 }
 0xbaf   :  { %v3102_v58 = vpop.f32.mrf.mxu1 }
 0xbb0   :  { %v1820_v59 = vmax.f32 %v1818_v52, %v1819_v56  ;;  %v1825_v60 = vmax.f32 %v1823_v54, %v1824_v57 }
 0xbb2   :  { %v1821_v61 = vrot.slane %v1820_v59, 1  ;;  %v1826_v62 = vrot.slane %v1825_v60, 2 }
 0xbb4   :  { %v1822_v63 = vmax.f32 %v1820_v59, %v1821_v61  ;;  %v1827_v1 = vmax.f32 %v1825_v60, %v1826_v62 }
 0xbb6   :  { %v1830_v2 = vsub.f32 %v1814_v43, %v1822_v63  ;;  %v1828_v5 = vrot.slane %v1827_v1, 1  ;;  %v2150_v43 = vsel %vm383_vm3, %v2145_v42, 0 }
 0xbb8   :  { %v1832_v6 = vmul.f32 1.442695, %v1830_v2  ;;  %v1829_v7 = vmax.f32 %v1827_v1, %v1828_v5 }
 0xbba   :  { %3303 = vpow2.f32 %v1832_v6  ;;  %v1831_v8 = vsub.f32 %v1815_v53, %v1829_v7 }
 0xbbc   :  { %v1834_v9 = vmul.f32 1.442695, %v1831_v8 }
 0xbbe   :  { %3305 = vpow2.f32 %v1834_v9 }
 0xbc7   :  { %v3304_v10 = vpop.eup %3303 }
 0xbc8   :  { %v1836_v11 = vsel %vm236_vm2, %v3304_v10, 0.0 }
 0xbc9   :  { %v1837_v12 = vrot.slane %v1836_v11, 4 }
 0xbcb   :  { %v3306_v13 = vpop.eup %3305  ;;  %v1838_v14 = vadd.f32 %v1837_v12, %v1836_v11 }
 0xbcc   :  { %v1843_v15 = vsel %vm236_vm2, %v3306_v13, 0.0 }
 0xbcd   :  { %v1839_v16 = vrot.slane %v1838_v14, 2  ;;  %v1844_v17 = vrot.slane %v1843_v15, 4 }
 0xbcf   :  { %v1840_v18 = vadd.f32 %v1839_v16, %v1838_v14  ;;  %v1845_v19 = vadd.f32 %v1844_v17, %v1843_v15 }
 0xbd1   :  { %v1841_v20 = vrot.slane %v1840_v18, 1  ;;  %v1846_v21 = vrot.slane %v1845_v19, 2 }
 0xbd3   :  { %v1842_v22 = vadd.f32 %v1841_v20, %v1840_v18  ;;  %v1847_v29 = vadd.f32 %v1846_v21, %v1845_v19 }
 0xbd5   :  { %3307 = vrcp.f32 %v1842_v22  ;;  %v1848_v32 = vrot.slane %v1847_v29, 1 }
 0xbd7   :  { %v1849_v23 = vadd.f32 %v1848_v32, %v1847_v29 }
 0xbd9   :  { %3309 = vrcp.f32 %v1849_v23 }
 0xbe2   :  { %v3308_v25 = vpop.eup %3307 }
 0xbe3   :  { %v1852_v27 = vmul.f32 %v3308_v25, %v3304_v10 }
 0xbe5   :  { %v1854_v30 = vpack.c.bf16 %v1852_v27, %v1852_v27 }
 0xbe6   :  { %v3310_v31 = vpop.eup %3309 }
 0xbe7   :  { %3106 = vmatmul.mubr.msk.bf16.vlgmr.msra.gmra.mxu0 %vm236_vm2, %v1854_v30  ;;  %v1853_v37 = vmul.f32 %v3310_v31, %v3306_v13 }
 0xbe8   :  { %3116 = vmatpush3.bf16.xpose.msra.mxu0 %v1960_v35  ;;  %3117 = vmatprep.mubr.msk.bf16.mxu0 %vm3565_vm0, %v3564_v0 }
 0xbe9   :  { %v1855_v38 = vpack.c.bf16 %v1853_v37, %v1853_v37  ;;  %3127 = vmatprep.subr.bf16.mxu0 %v3564_v0 }
 0xbeb   :  { %3112 = vmatmul.mubr.msk.bf16.vlgmr.msra.gmra.mxu1 %vm236_vm2, %v1855_v38 }
 0xbec   :  { %3122 = vmatpush3.bf16.xpose.msra.mxu1 %v2010_v40  ;;  %3123 = vmatprep.mubr.msk.bf16.mxu1 %vm3565_vm0, %v3564_v0 }
 0xbed   :  { %3133 = vmatprep.subr.bf16.mxu1 %v3564_v0 }
 0xbef   :  { %3118 = vmatmul.mubr.msk.bf16.vlgmr.msra.gmra.mxu0 %vm236_vm2, %v1953_v34 }
 0xbf0   :  { %3128 = vmatpush3.bf16.msra.mxu0 %v2102_v3  ;;  %3129 = vmatprep.mubr.msk.bf16.mxu0 %vm3565_vm0, %v3564_v0  ;;  %v2195_v3 = vpop.permute.xlu1 %2194 }
 0xbf1   :  { %3139 = vmatprep.subr.bf16.mxu0 %v3564_v0 }
 0xbf3   :  { %3124 = vmatmul.mubr.msk.bf16.vlgmr.msra.gmra.mxu1 %vm236_vm2, %v2003_v39 }
 0xbf4   :  { %3134 = vmatpush3.bf16.msra.mxu1 %v2150_v43  ;;  %3135 = vmatprep.mubr.msk.bf16.mxu1 %vm3565_vm0, %v3564_v0 }
 0xbf5   :  { %3145 = vmatprep.subr.bf16.mxu1 %v3564_v0 }
 0xca7   :  { %v1898_v44 = vpop.f32.mrf.mxu0 }
 0xca9   :  { %v3107_v45 = vpop.f32.mrf.mxu0 }
 0xcab   :  { %v1901_v4 = vpop.f32.mrf.mxu0  ;;  %v1946_v46 = vpop.f32.mrf.mxu1 }
 0xcac   :  { %v3230_v49 = vpack.i.bf16 %v1946_v46, %v1898_v44  ;;  %v2245_v44 = vpop.permute.xlu0 %2244  ;;  %v2193_v46 = vpop.permute.xlu1 %2192 }
 0xcad   :  { %v3108_v50 = vpop.f32.mrf.mxu0  ;;  %v3113_v51 = vpop.f32.mrf.mxu1 }
 0xcae   :  { %3231 = vrot.lane.b32.xlu1 %v3230_v49, %s3554_s19  ;;  %v2200_v49 = vsel %vm236_vm2, %v2195_v3, 0 }
 0xcaf   :  { %v1949_v52 = vpop.f32.mrf.mxu1  ;;  %v1996_v53 = vpop.f32.mrf.mxu0 }
 0xcb0   :  { %v2052_v54 = vmul.f32 0.35355338, %v1996_v53  ;;  %v2243_v52 = vpop.permute.xlu0 %2242  ;;  %v2250_v53 = vsel %vm236_vm2, %v2245_v44, 0 }
 0xcb1   :  { %v3114_v55 = vpop.f32.mrf.mxu1  ;;  %v3119_v56 = vpop.f32.mrf.mxu0 }
 0xcb2   :  { %v2054_v57 = vsel %vm3726_vm4, %v2052_v54, -1e+09  ;;  %v2337_v54 = vpop.permute.xlu1 %2336 }
 0xcb3   :  { %v2056_v58 = vsel %vm236_vm2, %v2054_v57, -inf  ;;  %v1999_v59 = vpop.f32.mrf.mxu0  ;;  %v2046_v60 = vpop.f32.mrf.mxu1  ;;  %v2342_v55 = vsel %vm383_vm3, %v2337_v54, 0 }
 0xcb4   :  { %v2057_v61 = vrot.slane %v2056_v58, 4  ;;  %v2053_v62 = vmul.f32 0.35355338, %v2046_v60  ;;  %v2385_v56 = vpop.permute.xlu0 %2384 }
 0xcb5   :  { %v3120_v63 = vpop.f32.mrf.mxu0  ;;  %v3125_v1 = vpop.f32.mrf.mxu1 }
 0xcb6   :  { %v2058_v2 = vmax.f32 %v2056_v58, %v2057_v61  ;;  %v2055_v5 = vsel %vm3726_vm4, %v2053_v62, -1e+09 }
 0xcb7   :  { %v2063_v6 = vsel %vm236_vm2, %v2055_v5, -inf  ;;  %v2049_v7 = vpop.f32.mrf.mxu1 }
 0xcb8   :  { %v2059_v8 = vrot.slane %v2058_v2, 2  ;;  %v2064_v9 = vrot.slane %v2063_v6, 4 }
 0xcb9   :  { %v3126_v10 = vpop.f32.mrf.mxu1 }
 0xcba   :  { %v2060_v11 = vmax.f32 %v2058_v2, %v2059_v8  ;;  %v2065_v12 = vmax.f32 %v2063_v6, %v2064_v9 }
 0xcbc   :  { %v2061_v13 = vrot.slane %v2060_v11, 1  ;;  %v2066_v14 = vrot.slane %v2065_v12, 2 }
 0xcbe   :  { %v2062_v15 = vmax.f32 %v2060_v11, %v2061_v13  ;;  %v2067_v16 = vmax.f32 %v2065_v12, %v2066_v14 }
 0xcc0   :  { %v2070_v17 = vsub.f32 %v2054_v57, %v2062_v15  ;;  %v2068_v18 = vrot.slane %v2067_v16, 1  ;;  %v2390_v57 = vsel %vm383_vm3, %v2385_v56, 0 }
 0xcc2   :  { %v2072_v19 = vmul.f32 1.442695, %v2070_v17  ;;  %v2069_v20 = vmax.f32 %v2067_v16, %v2068_v18 }
 0xcc4   :  { %3311 = vpow2.f32 %v2072_v19  ;;  %v2071_v21 = vsub.f32 %v2055_v5, %v2069_v20 }
 0xcc6   :  { %v2074_v22 = vmul.f32 1.442695, %v2071_v21 }
 0xcc8   :  { %3313 = vpow2.f32 %v2074_v22 }
 0xcd1   :  { %v3312_v29 = vpop.eup %3311 }
 0xcd2   :  { %v2076_v32 = vsel %vm236_vm2, %v3312_v29, 0.0 }
 0xcd3   :  { %v2077_v23 = vrot.slane %v2076_v32, 4 }
 0xcd5   :  { %v3314_v24 = vpop.eup %3313  ;;  %v2078_v25 = vadd.f32 %v2077_v23, %v2076_v32 }
 0xcd6   :  { %v2083_v27 = vsel %vm236_vm2, %v3314_v24, 0.0 }
 0xcd7   :  { %v2079_v28 = vrot.slane %v2078_v25, 2  ;;  %v2084_v30 = vrot.slane %v2083_v27, 4 }
 0xcd9   :  { %v2080_v31 = vadd.f32 %v2079_v28, %v2078_v25  ;;  %v2085_v34 = vadd.f32 %v2084_v30, %v2083_v27 }
 0xcdb   :  { %v2081_v35 = vrot.slane %v2080_v31, 1  ;;  %v2086_v37 = vrot.slane %v2085_v34, 2 }
 0xcdd   :  { %v2082_v38 = vadd.f32 %v2081_v35, %v2080_v31  ;;  %v2087_v39 = vadd.f32 %v2086_v37, %v2085_v34 }
 0xcdf   :  { %3315 = vrcp.f32 %v2082_v38  ;;  %v2088_v40 = vrot.slane %v2087_v39, 1 }
 0xce1   :  { %v2089_v41 = vadd.f32 %v2088_v40, %v2087_v39 }
 0xce3   :  { %3317 = vrcp.f32 %v2089_v41 }
 0xcec   :  { %v3316_v42 = vpop.eup %3315 }
 0xced   :  { %v2092_v43 = vmul.f32 %v3316_v42, %v3312_v29 }
 0xcef   :  { %v2094_v45 = vpack.c.bf16 %v2092_v43, %v2092_v43 }
 0xcf0   :  { %v3318_v4 = vpop.eup %3317 }
 0xcf1   :  { %3130 = vmatmul.mubr.msk.bf16.vlgmr.msra.gmra.mxu0 %vm236_vm2, %v2094_v45  ;;  %v2093_v50 = vmul.f32 %v3318_v4, %v3314_v24 }
 0xcf2   :  { %3140 = vmatpush3.bf16.xpose.msra.mxu0 %v2200_v49  ;;  %3141 = vmatprep.mubr.msk.bf16.mxu0 %vm3565_vm0, %v3564_v0 }
 0xcf3   :  { %v2095_v51 = vpack.c.bf16 %v2093_v50, %v2093_v50  ;;  %3151 = vmatprep.subr.bf16.mxu0 %v3564_v0 }
 0xcf5   :  { %3136 = vmatmul.mubr.msk.bf16.vlgmr.msra.gmra.mxu1 %vm236_vm2, %v2095_v51 }
 0xcf6   :  { %3146 = vmatpush3.bf16.xpose.msra.mxu1 %v2250_v53  ;;  %3147 = vmatprep.mubr.msk.bf16.mxu1 %vm3565_vm0, %v3564_v0 }
 0xcf7   :  { %3157 = vmatprep.subr.bf16.mxu1 %v3564_v0 }
 0xcf9   :  { %3142 = vmatmul.mubr.msk.bf16.vlgmr.msra.gmra.mxu0 %vm236_vm2, %v2193_v46 }
 0xcfa   :  { %3152 = vmatpush3.bf16.msra.mxu0 %v2342_v55  ;;  %3153 = vmatprep.mubr.msk.bf16.mxu0 %vm3565_vm0, %v3564_v0 }
 0xcfb   :  { %3163 = vmatprep.subr.bf16.mxu0 %v3564_v0 }
 0xcfd   :  { %3148 = vmatmul.mubr.msk.bf16.vlgmr.msra.gmra.mxu1 %vm236_vm2, %v2243_v52 }
 0xcfe   :  { %3158 = vmatpush3.bf16.msra.mxu1 %v2390_v57  ;;  %3159 = vmatprep.mubr.msk.bf16.mxu1 %vm3565_vm0, %v3564_v0 }
 0xcff   :  { %3171 = vmatprep.subr.bf16.mxu1 %v3564_v0 }
 0xdb1   :  { %v2138_v58 = vpop.f32.mrf.mxu0 }
 0xdb3   :  { %v3131_v59 = vpop.f32.mrf.mxu0 }
 0xdb5   :  { %v2141_v60 = vpop.f32.mrf.mxu0  ;;  %v2186_v61 = vpop.f32.mrf.mxu1 }
 0xdb6   :  { %v3235_v62 = vpack.i.bf16 %v2186_v61, %v2138_v58  ;;  %v3253_v60 = vld [vmem:[#allocation16 + $0x18] sm:$0xff]   ;;  %v3254_v61 = vld [vmem:[#allocation16 + $0x10] sm:$0xff]  }
 0xdb7   :  { %v3132_v63 = vpop.f32.mrf.mxu0  ;;  %v3137_v1 = vpop.f32.mrf.mxu1 }
 0xdb8   :  { %3236 = vrot.lane.b32.xlu0 %v3235_v62, %s3576_s26 }
 0xdb9   :  { %v2189_v2 = vpop.f32.mrf.mxu1  ;;  %v2236_v5 = vpop.f32.mrf.mxu0 }
 0xdba   :  { %v2292_v6 = vmul.f32 0.35355338, %v2236_v5 }
 0xdbb   :  { %v3138_v7 = vpop.f32.mrf.mxu1  ;;  %v3143_v8 = vpop.f32.mrf.mxu0 }
 0xdbc   :  { %v2294_v9 = vsel %vm3726_vm4, %v2292_v6, -1e+09 }
 0xdbd   :  { %v2296_v10 = vsel %vm236_vm2, %v2294_v9, -inf  ;;  %v2239_v11 = vpop.f32.mrf.mxu0  ;;  %v2286_v12 = vpop.f32.mrf.mxu1 }
 0xdbe   :  { %v2297_v13 = vrot.slane %v2296_v10, 4  ;;  %v2293_v14 = vmul.f32 0.35355338, %v2286_v12 }
 0xdbf   :  { %v3144_v15 = vpop.f32.mrf.mxu0  ;;  %v3149_v16 = vpop.f32.mrf.mxu1 }
 0xdc0   :  { %v2298_v17 = vmax.f32 %v2296_v10, %v2297_v13  ;;  %v2295_v18 = vsel %vm3726_vm4, %v2293_v14, -1e+09  ;;  %v3232_v10 = vpop.permute.xlu1 %3231 }
 0xdc1   :  { %v2303_v19 = vsel %vm236_vm2, %v2295_v18, -inf  ;;  %v2289_v20 = vpop.f32.mrf.mxu1  ;;  %v3234_v12 = vunpack.i.h.bf16 %v3232_v10  ;;  %v3233_v13 = vunpack.i.l.bf16 %v3232_v10 }
 0xdc2   :  { %v2299_v21 = vrot.slane %v2298_v17, 2  ;;  %v2304_v22 = vrot.slane %v2303_v19, 4 }
 0xdc3   :  { %v3150_v29 = vpop.f32.mrf.mxu1 }
 0xdc4   :  { %v2300_v32 = vmax.f32 %v2298_v17, %v2299_v21  ;;  %v2305_v23 = vmax.f32 %v2303_v19, %v2304_v22  ;;  %v2457_v17 = vsel %vm236_vm2, %v3943_v36, %v3234_v12 }
 0xdc6   :  { %v2301_v24 = vrot.slane %v2300_v32, 1  ;;  %v2306_v25 = vrot.slane %v2305_v23, 2 }
 0xdc8   :  { %v2302_v27 = vmax.f32 %v2300_v32, %v2301_v24  ;;  %v2307_v28 = vmax.f32 %v2305_v23, %v2306_v25 }
 0xdca   :  { %v2310_v30 = vsub.f32 %v2294_v9, %v2302_v27  ;;  %v2308_v31 = vrot.slane %v2307_v28, 1 }
 0xdcc   :  { %v2312_v34 = vmul.f32 1.442695, %v2310_v30  ;;  %v2309_v35 = vmax.f32 %v2307_v28, %v2308_v31 }
 0xdce   :  { %3319 = vpow2.f32 %v2312_v34  ;;  %v2311_v37 = vsub.f32 %v2295_v18, %v2309_v35  ;;  %v2456_v18 = vsel %vm236_vm2, %v3941_v33, %v3233_v13  ;;  %v2838_v33 = vld [vmem:[%s4083_s9 + $0x1] ss:$0 sm:$0xff] }
 0xdd0   :  { %v2314_v26 = vmul.f32 1.442695, %v2311_v37 }
 0xdd2   :  { %3321 = vpow2.f32 %v2314_v26 }
 0xddb   :  { %v3320_v38 = vpop.eup %3319 }
 0xddc   :  { %v2316_v39 = vsel %vm236_vm2, %v3320_v38, 0.0 }
 0xddd   :  { %v2317_v40 = vrot.slane %v2316_v39, 4 }
 0xddf   :  { %v3322_v41 = vpop.eup %3321  ;;  %v2318_v3 = vadd.f32 %v2317_v40, %v2316_v39 }
 0xde0   :  { %v2323_v42 = vsel %vm236_vm2, %v3322_v41, 0.0 }
 0xde1   :  { %v2319_v43 = vrot.slane %v2318_v3, 2  ;;  %v2324_v44 = vrot.slane %v2323_v42, 4 }
 0xde3   :  { %v2320_v45 = vadd.f32 %v2319_v43, %v2318_v3  ;;  %v2325_v4 = vadd.f32 %v2324_v44, %v2323_v42 }
 0xde5   :  { %v2321_v46 = vrot.slane %v2320_v45, 1  ;;  %v2326_v49 = vrot.slane %v2325_v4, 2 }
 0xde7   :  { %v2322_v50 = vadd.f32 %v2321_v46, %v2320_v45  ;;  %v2327_v51 = vadd.f32 %v2326_v49, %v2325_v4  ;;  %v3255_v45 = vld [vmem:[#allocation16 + $0x28] sm:$0xff]  }
 0xde9   :  { %3323 = vrcp.f32 %v2322_v50  ;;  %v2328_v52 = vrot.slane %v2327_v51, 1 }
 0xdeb   :  { %v2329_v53 = vadd.f32 %v2328_v52, %v2327_v51 }
 0xded   :  { %3325 = vrcp.f32 %v2329_v53 }
 0xdf6   :  { %v3324_v54 = vpop.eup %3323 }
 0xdf7   :  { %v2332_v55 = vmul.f32 %v3324_v54, %v3320_v38 }
 0xdf9   :  { %v2334_v56 = vpack.c.bf16 %v2332_v55, %v2332_v55  ;;  %v2842_v55 = vld [vmem:[%s4083_s9 + $0x6] ss:$0 sm:$0xff] }
 0xdfa   :  { %v3326_v57 = vpop.eup %3325 }
 0xdfb   :  { %3154 = vmatmul.mubr.msk.bf16.vlgmr.msra.gmra.mxu0 %vm236_vm2, %v2334_v56  ;;  %v2333_v58 = vmul.f32 %v3326_v57, %v3322_v41 }
 0xdfc   :  { %3167 = vmatprep.mubr.msk.bf16.mxu0 %vm3565_vm0, %v3564_v0  ;;  %3164 = vmatpush3.bf16.msra.mxu0 %v3253_v60 }
 0xdfd   :  { %v2335_v59 = vpack.c.bf16 %v2333_v58, %v2333_v58  ;;  %3165 = vmatprep.subr.bf16.mxu0 %v3564_v0 }
 0xdff   :  { %3160 = vmatmul.mubr.msk.bf16.vlgmr.msra.gmra.mxu1 %vm236_vm2, %v2335_v59  ;;  %v2843_v59 = vld [vmem:[%s4083_s9 + $0x7] ss:$0 sm:$0xff] }
 0xe00   :  { %3175 = vmatprep.mubr.msk.bf16.mxu1 %vm3565_vm0, %v3564_v0  ;;  %3166 = vmatpush3.bf16.msra.mxu0 %v3254_v61 }
 0xe01   :  { %3179 = vmatprep.subr.bf16.mxu0 %v3564_v0  ;;  %3172 = vmatpush3.bf16.msra.mxu1 %v3255_v45 }
 0xe02   :  { %3173 = vmatprep.subr.bf16.mxu1 %v3564_v0 }
 0xe2a   :  { %v3237_v11 = vpop.permute.xlu0 %3236 }
 0xe2b   :  { %v3239_v14 = vunpack.i.h.bf16 %v3237_v11  ;;  %v3238_v15 = vunpack.i.l.bf16 %v3237_v11 }
 0xe2d   :  { %v2459_v21 = vsel %vm1221_vm5, %v2457_v17, %v3239_v14  ;;  %v2458_v22 = vsel %vm1221_vm5, %v2456_v18, %v3238_v15 }
 0xebb   :  { %v2378_v62 = vpop.f32.mrf.mxu0 }
 0xebd   :  { %v3155_v63 = vpop.f32.mrf.mxu0 }
 0xebf   :  { %v2381_v1 = vpop.f32.mrf.mxu0  ;;  %v2426_v2 = vpop.f32.mrf.mxu1 }
 0xec0   :  { %v3240_v5 = vpack.i.bf16 %v2426_v2, %v2378_v62  ;;  %v3257_v1 = vld [vmem:[#allocation16 + $0x38] sm:$0xff]   ;;  %v3258_v2 = vld [vmem:[#allocation16 + $0x30] sm:$0xff]  }
 0xec1   :  { %v3156_v6 = vpop.f32.mrf.mxu0  ;;  %v3161_v7 = vpop.f32.mrf.mxu1 }
 0xec2   :  { %3241 = vrot.lane.b32.xlu1 %v3240_v5, %s3577_s27  ;;  %v2844_v5 = vld [vmem:[%s4083_s9 + $0x2] ss:$0 sm:$0xff] }
 0xec3   :  { %v2429_v8 = vpop.f32.mrf.mxu1 }
 0xec5   :  { %v3162_v9 = vpop.f32.mrf.mxu1 }
 0xf34   :  { %v3242_v16 = vpop.permute.xlu1 %3241 }
 0xf35   :  { %v3244_v19 = vunpack.i.h.bf16 %v3242_v16  ;;  %v3243_v20 = vunpack.i.l.bf16 %v3242_v16 }
 0xf37   :  { %v2461_v29 = vsel %vm1224_vm6, %v2459_v21, %v3244_v19  ;;  %v2460_v32 = vsel %vm1224_vm6, %v2458_v22, %v3243_v20 }
 0xf38   :  { %v2462_v23 = vpack.c.bf16 %v2461_v29, %v2460_v32 }
 0xf3a   :  { %3168 = vmatmul.mubr.msk.bf16.vlgmr.msra.gmra.mxu0 %vm186_vm1, %v2462_v23 }
 0xf3b   :  { %3183 = vmatprep.mubr.msk.bf16.mxu0 %vm3565_vm0, %v3564_v0  ;;  %3180 = vmatpush3.bf16.msra.mxu0 %v3257_v1 }
 0xf3c   :  { %3181 = vmatprep.subr.bf16.mxu0 %v3564_v0 }
 0xf3f   :  { %3182 = vmatpush3.bf16.msra.mxu0 %v3258_v2 }
 0xffa   :  { %v2522_v36 = vpop.f32.mrf.mxu0 }
 0xffb   :  { %v2523_v24 = vadd.f32 %v2838_v33, %v2522_v36 }
 0xffc   :  { %v3169_v25 = vpop.f32.mrf.mxu0 }
 0xffd   :  { %v2529_v27 = vadd.f32 %v2523_v24, %v3860_v47 }
 0xffe   :  { %v2525_v28 = vpop.f32.mrf.mxu0 }
 0xfff   :  { %v2526_v30 = vadd.f32 %v2838_v33, %v2525_v28  ;;  %v2531_v31 = vsel %vm186_vm1, %v2529_v27, 0.0 }
0x1000   :  { %2532 = vadd.xlane.f32.xlu0 %v2531_v31  ;;  %v3170_v34 = vpop.f32.mrf.mxu0 }
0x1001   :  { %v2530_v35 = vadd.f32 %v2526_v30, %v3862_v48  ;;  %v3256_v48 = vld [vmem:[#allocation16 + $0x20] sm:$0xff]  }
0x1002   :  { %3174 = vmatpush3.bf16.msra.mxu1 %v3256_v48 }
0x1003   :  { %v2534_v37 = vsel %vm186_vm1, %v2530_v35, 0.0 }
0x1004   :  { %2535 = vadd.xlane.f32.xlu1 %v2534_v37 }
0x1089   :  { %v2533_v26 = vpop.xlane.xlu0 %2532 }
0x108a   :  { %v2537_v38 = vmul.f32 0.03125, %v2533_v26 }
0x108c   :  { %v2539_v39 = vsub.f32 %v2529_v27, %v2537_v38  ;;  %v2848_v27 = vld [vmem:[%s4083_s9 + $0x3] ss:$0 sm:$0xff] }
0x108d   :  { %v2536_v40 = vpop.xlane.xlu1 %2535 }
0x108e   :  { %v2538_v41 = vmul.f32 0.03125, %v2536_v40  ;;  %v2541_v3 = vmul.f32 %v2539_v39, %v2539_v39 }
0x1090   :  { %v2540_v42 = vsub.f32 %v2530_v35, %v2538_v41  ;;  %v2543_v47 = vsel %vm186_vm1, %v2541_v3, 0.0 }
0x1091   :  { %2544 = vadd.xlane.f32.xlu0 %v2543_v47 }
0x1092   :  { %v2542_v43 = vmul.f32 %v2540_v42, %v2540_v42 }
0x1094   :  { %v2546_v44 = vsel %vm186_vm1, %v2542_v43, 0.0 }
0x1095   :  { %2547 = vadd.xlane.f32.xlu0 %v2546_v44 }
0x111a   :  { %v2545_v4 = vpop.xlane.xlu0 %2544 }
0x111b   :  { %v2549_v46 = vmul.f32 0.03125, %v2545_v4 }
0x111d   :  { %v2551_v49 = vadd.f32 1e-05, %v2549_v46 }
0x111e   :  { %v2548_v50 = vpop.xlane.xlu0 %2547 }
0x111f   :  { %3327 = vrsqrt.f32 %v2551_v49  ;;  %v2550_v51 = vmul.f32 0.03125, %v2548_v50 }
0x1121   :  { %v2552_v52 = vadd.f32 1e-05, %v2550_v51 }
0x1123   :  { %3329 = vrsqrt.f32 %v2552_v52 }
0x112c   :  { %v3328_v53 = vpop.eup %3327 }
0x112d   :  { %v2555_v54 = vmul.f32 %v3328_v53, %v2539_v39 }
0x112f   :  { %v2562_v58 = vmul.f32 %v2842_v55, %v2555_v54 }
0x1130   :  { %v3330_v56 = vpop.eup %3329 }
0x1131   :  { %v2556_v57 = vmul.f32 %v3330_v56, %v2540_v42  ;;  %v2569_v61 = vadd.f32 %v2843_v59, %v2562_v58  ;;  %v2852_v56 = vld [vmem:[%s4083_s9 + $0x8] ss:$0 sm:$0xff]  ;;  %v2853_v58 = vld [vmem:[%s4083_s9 + $0x9] ss:$0 sm:$0xff] }
0x1133   :  { %v2563_v60 = vmul.f32 %v2842_v55, %v2556_v57 }
0x1135   :  { %v2570_v62 = vadd.f32 %v2843_v59, %v2563_v60 }
0x1137   :  { %v2571_v63 = vpack.c.bf16 %v2570_v62, %v2569_v61 }
0x1139   :  { %3176 = vmatmul.mubr.msk.bf16.vlgmr.msra.gmra.mxu1 %vm186_vm1, %v2571_v63 }
0x11f9   :  { %v2631_v6 = vpop.f32.mrf.mxu1 }
0x11fa   :  { %v2632_v7 = vadd.f32 %v2844_v5, %v2631_v6 }
0x11fb   :  { %v3177_v8 = vpop.f32.mrf.mxu1 }
0x11fc   :  { %v2640_v9 = vmul.f32 0.044715, %v2632_v7  ;;  %v2638_v32 = vmul.f32 0.5, %v2632_v7 }
0x11fd   :  { %v2634_v10 = vpop.f32.mrf.mxu1 }
0x11fe   :  { %v2642_v11 = vmul.f32 %v2640_v9, %v2632_v7  ;;  %v2635_v12 = vadd.f32 %v2844_v5, %v2634_v10 }
0x11ff   :  { %v3178_v13 = vpop.f32.mrf.mxu1 }
0x1200   :  { %v2644_v14 = vmul.f32 %v2642_v11, %v2632_v7  ;;  %v2641_v15 = vmul.f32 0.044715, %v2635_v12  ;;  %v2639_v23 = vmul.f32 0.5, %v2635_v12 }
0x1202   :  { %v2646_v16 = vadd.f32 %v2644_v14, %v2632_v7  ;;  %v2643_v17 = vmul.f32 %v2641_v15, %v2635_v12 }
0x1204   :  { %v2648_v18 = vmul.f32 0.7978846, %v2646_v16  ;;  %v2645_v19 = vmul.f32 %v2643_v17, %v2635_v12 }
0x1206   :  { %3331 = vtanh.f32 %v2648_v18  ;;  %v2647_v0 = vadd.f32 %v2645_v19, %v2635_v12 }
0x1208   :  { %v2649_v20 = vmul.f32 0.7978846, %v2647_v0 }
0x120a   :  { %3333 = vtanh.f32 %v2649_v20 }
0x1213   :  { %v3332_v21 = vpop.eup %3331 }
0x1214   :  { %v2652_v22 = vadd.f32 1.0, %v3332_v21 }
0x1216   :  { %v2654_v36 = vmul.f32 %v2652_v22, %v2638_v32 }
0x1217   :  { %v3334_v29 = vpop.eup %3333 }
0x1218   :  { %v2653_v33 = vadd.f32 1.0, %v3334_v29 }
0x121a   :  { %v2655_v24 = vmul.f32 %v2653_v33, %v2639_v23 }
0x121c   :  { %v2656_v25 = vpack.c.bf16 %v2655_v24, %v2654_v36 }
0x121e   :  { %3184 = vmatmul.mubr.msk.bf16.vlgmr.msra.gmra.mxu0 %vm186_vm1, %v2656_v25 }
0x12de   :  { %v2716_v28 = vpop.f32.mrf.mxu0 }
0x12df   :  { %v2717_v30 = vadd.f32 %v2848_v27, %v2716_v28 }
0x12e0   :  { %v3185_v31 = vpop.f32.mrf.mxu0 }
0x12e1   :  { %v2723_v34 = vadd.f32 %v2717_v30, %v2569_v61 }
0x12e2   :  { %v2719_v35 = vpop.f32.mrf.mxu0 }
0x12e3   :  { %v2720_v37 = vadd.f32 %v2848_v27, %v2719_v35  ;;  %v2725_v26 = vsel %vm186_vm1, %v2723_v34, 0.0 }
0x12e4   :  { %2726 = vadd.xlane.f32.xlu1 %v2725_v26  ;;  %v3186_v38 = vpop.f32.mrf.mxu0 }
0x12e5   :  { %v2724_v39 = vadd.f32 %v2720_v37, %v2570_v62 }
0x12e7   :  { %v2728_v40 = vsel %vm186_vm1, %v2724_v39, 0.0 }
0x12e8   :  { %2729 = vadd.xlane.f32.xlu0 %v2728_v40 }
0x136d   :  { %v2727_v41 = vpop.xlane.xlu1 %2726 }
0x136e   :  { %v2731_v3 = vmul.f32 0.03125, %v2727_v41 }
0x1370   :  { %v2733_v42 = vsub.f32 %v2723_v34, %v2731_v3 }
0x1371   :  { %v2730_v47 = vpop.xlane.xlu0 %2729 }
0x1372   :  { %v2732_v43 = vmul.f32 0.03125, %v2730_v47  ;;  %v2735_v44 = vmul.f32 %v2733_v42, %v2733_v42 }
0x1374   :  { %v2734_v45 = vsub.f32 %v2724_v39, %v2732_v43  ;;  %v2737_v48 = vsel %vm186_vm1, %v2735_v44, 0.0 }
0x1375   :  { %2738 = vadd.xlane.f32.xlu1 %v2737_v48 }
0x1376   :  { %v2736_v4 = vmul.f32 %v2734_v45, %v2734_v45 }
0x1378   :  { %v2740_v46 = vsel %vm186_vm1, %v2736_v4, 0.0 }
0x1379   :  { %2741 = vadd.xlane.f32.xlu0 %v2740_v46 }
0x13fe   :  { %v2739_v49 = vpop.xlane.xlu1 %2738 }
0x13ff   :  { %v2743_v50 = vmul.f32 0.03125, %v2739_v49 }
0x1401   :  { %v2745_v51 = vadd.f32 1e-05, %v2743_v50 }
0x1402   :  { %v2742_v52 = vpop.xlane.xlu0 %2741 }
0x1403   :  { %3335 = vrsqrt.f32 %v2745_v51  ;;  %v2744_v53 = vmul.f32 0.03125, %v2742_v52 }
0x1405   :  { %v2746_v54 = vadd.f32 1e-05, %v2744_v53 }
0x1407   :  { %3337 = vrsqrt.f32 %v2746_v54 }
0x1410   :  { %v3336_v55 = vpop.eup %3335 }
0x1411   :  { %v2749_v57 = vmul.f32 %v3336_v55, %v2733_v42 }
0x1413   :  { %v2756_v59 = vmul.f32 %v2852_v56, %v2749_v57 }
0x1414   :  { %v3338_v60 = vpop.eup %3337 }
0x1415   :  { %v2750_v61 = vmul.f32 %v3338_v60, %v2734_v45  ;;  %v2763_v62 = vadd.f32 %v2853_v58, %v2756_v59 }
0x1417   :  { %v2757_v63 = vmul.f32 %v2852_v56, %v2750_v61  ;;  %2765 = vst.msk [vmem:[#allocation17] sm:$0xff] %vm186_vm1, %v2763_v62 }
0x1419   :  { %v2764_v1 = vadd.f32 %v2853_v58, %v2757_v63 }
0x141b   :  { %2766 = vst.msk [vmem:[#allocation17 + $0x8] sm:$0xff] %vm186_vm1, %v2764_v1 }
0x141c   :  { %3530 = shalt.err (!%p3527_p7)
}
0x141d   :  { %2778 = dma.vmem_to_hbm [thread:$0]  %s2773_s23, 256, %s4084_s10, [#allocation4], %s3553_s18, %s3553_s18, %s3554_s19  }
0x141e   :  { %3549 = dma.done.wait [#allocation4], 256  }
0x141f   :  { %3550 = vsyncadd [#allocation4], 4294967040 }
0x1420   :  { %2782 = vsyncpa [#allocation3], 1 }
0x1421   :  { %2783 = vsyncpa [#allocation6], 1 }
0x1422   :  { %2784 = vsyncpa [#allocation9], 1 }
0x1423   :  { %2785 = vsyncpa [#allocation12], 1 }
0x1424   :  { %2786 = vsyncpa [#allocation15], 1 }
0x1425   :  { %2787 = vsyncpa [#allocation4], 1 }

</bundles_post_ra>
